<compile_context>
chip_gen: v6e
topology: v6e:2x2x1
jax: 0.10.0
libtpu: 0.0.40
codegen_flags: <defaults>
</compile_context>

<pallas_src>
import functools

import jax
import jax.numpy as jnp
from jax.experimental import pallas as pl
from jax.experimental.pallas import tpu as pltpu

_EPS = 1e-5
_VMEM_LIMIT_BYTES = 48 * 1024 * 1024    # raise scoped VMEM (v5e default is 16 MiB)
_TILE_VMEM_BUDGET = 20 * 1024 * 1024    # working-set target; safe on v7x's 64 MiB


def _round_up(x, m):
    return (x + m - 1) // m * m


# ----------------------------- Pallas kernels ------------------------------ #
def _matmul_act_kernel(p_ref, w_ref, o_ref, *, act):
    """Row-tile of  act(patches @ W)  for layers without BatchNorm."""
    acc = jnp.dot(p_ref[...], w_ref[...], preferred_element_type=jnp.float32)
    if act == "leaky":
        acc = jnp.where(acc >= 0.0, acc, 0.2 * acc)
    elif act == "sigmoid":
        acc = jax.nn.sigmoid(acc)
    o_ref[...] = acc


def _matmul_stats_kernel(p_ref, w_ref, o_ref, sum_ref, sq_ref):
    """Row-tile of  patches @ W  plus per-tile column sum / sum-of-squares.

    Each grid step writes its own partial-stat block, so the row axis stays
    fully parallel; the tiny cross-tile reduction is done in JAX.
    """
    acc = jnp.dot(p_ref[...], w_ref[...], preferred_element_type=jnp.float32)
    o_ref[...] = acc
    # (Cp,) column reductions, replicated over 8 sublanes for an aligned store.
    sum_ref[...] = jnp.broadcast_to(jnp.sum(acc, axis=0), sum_ref.shape)
    sq_ref[...] = jnp.broadcast_to(jnp.sum(acc * acc, axis=0), sq_ref.shape)


def _bn_act_kernel(x_ref, scale_ref, shift_ref, o_ref):
    """Row-tile of  LeakyReLU(x * scale + shift)  (BN folded into scale/shift)."""
    y = x_ref[...] * scale_ref[...] + shift_ref[...]
    o_ref[...] = jnp.where(y >= 0.0, y, 0.2 * y)


# ------------------------------ JAX glue ----------------------------------- #
def _im2col_nhwc(x, k, s, p):
    """x: (N, H, W, C) -> (N*Ho*Wo, k*k*C) patches, columns ordered (kh, kw, c)."""
    N, H, W, C = x.shape
    xp = jnp.pad(x, ((0, 0), (p, p), (p, p), (0, 0)))
    Ho = (H + 2 * p - k) // s + 1
    Wo = (W + 2 * p - k) // s + 1
    cols = []
    for i in range(k):
        for j in range(k):
            cols.append(xp[:, i:i + s * (Ho - 1) + 1:s,
                           j:j + s * (Wo - 1) + 1:s, :])   # (N, Ho, Wo, C)
    pat = jnp.stack(cols, axis=3)                          # (N, Ho, Wo, k*k, C)
    pat = pat.reshape(N * Ho * Wo, k * k * C)
    return pat, Ho, Wo


def _choose_tile_rows(R, Kp, Cp):
    """Pick row tile: fits budget (resident bf16 weight + double-buffered tiles)."""
    fixed = Kp * Cp * 2                              # resident bf16 weight
    per_row = 2 * (Kp * 2 + Cp * 4)                  # 2-buffered bf16 in + f32 out
    tr = (_TILE_VMEM_BUDGET - fixed) // max(per_row, 1)
    tr = max(8, min(512, (tr // 8) * 8))
    if R <= tr:
        return _round_up(R, 8)
    return tr


def _prep_layer(w, gamma, beta):
    """OIHW conv weight -> padded (Kp, Cp) bf16 matmul weight + padded BN params."""
    Cout, Cin, kh, kw = w.shape
    K = kh * kw * Cin
    Kp = _round_up(K, 128)
    Cp = _round_up(Cout, 128)
    wmat = jnp.transpose(w, (2, 3, 1, 0)).reshape(K, Cout)        # rows (kh,kw,cin)
    wmat = jnp.pad(wmat, ((0, Kp - K), (0, Cp - Cout))).astype(jnp.bfloat16)
    g = jnp.pad(gamma.astype(jnp.float32), (0, Cp - Cout))        # pad gamma=0
    b = jnp.pad(beta.astype(jnp.float32), (0, Cp - Cout))         # pad beta=0
    return {"wmat": wmat, "gamma": g, "beta": b, "k": int(kh), "cout": int(Cout)}


def prepare_params(raw):
    return [
        _prep_layer(raw["w1"], raw["g1"], raw["b1"]),
        _prep_layer(raw["w2"], raw["g2"], raw["b2"]),
        _prep_layer(raw["w3"], raw["g3"], raw["b3"]),
        _prep_layer(raw["w4"], raw["g4"], raw["b4"]),
    ]


def _conv_block(x, lp, *, stride, pad, use_bn, act):
    """One Conv2d (+BatchNorm) (+activation) layer.  x is NHWC, returns NHWC."""
    N, H, W, C = x.shape
    k, Cout = lp["k"], lp["cout"]
    wmat = lp["wmat"]
    Kp, Cp = wmat.shape

    patches, Ho, Wo = _im2col_nhwc(x, k, stride, pad)
    R, K = patches.shape
    TR = _choose_tile_rows(R, Kp, Cp)
    Rp = _round_up(R, TR)
    nR = Rp // TR
    # zero-pad rows (to tile multiple) and K (to lane multiple); zeros are
    # harmless for the matmul and contribute nothing to the BN statistics.
    patches = jnp.pad(patches, ((0, Rp - R), (0, Kp - K))).astype(jnp.bfloat16)

    cparams = pltpu.CompilerParams(
        dimension_semantics=("parallel",),          # megacore-split row tiles (v7x)
        vmem_limit_bytes=_VMEM_LIMIT_BYTES,
    )

    if not use_bn:
        out = pl.pallas_call(
            functools.partial(_matmul_act_kernel, act=act),
            out_shape=jax.ShapeDtypeStruct((Rp, Cp), jnp.float32),
            grid_spec=pl.GridSpec(
                grid=(nR,),
                in_specs=[
                    pl.BlockSpec((TR, Kp), lambda r: (r, 0)),
                    pl.BlockSpec((Kp, Cp), lambda r: (0, 0)),
                ],
                out_specs=pl.BlockSpec((TR, Cp), lambda r: (r, 0)),
            ),
            compiler_params=cparams,
        )(patches, wmat)
    else:
        # Pass 1: tiled matmul + per-tile column stats (row axis stays parallel).
        conv, sums, sqs = pl.pallas_call(
            _matmul_stats_kernel,
            out_shape=(
                jax.ShapeDtypeStruct((Rp, Cp), jnp.float32),
                jax.ShapeDtypeStruct((nR, 8, Cp), jnp.float32),
                jax.ShapeDtypeStruct((nR, 8, Cp), jnp.float32),
            ),
            grid_spec=pl.GridSpec(
                grid=(nR,),
                in_specs=[
                    pl.BlockSpec((TR, Kp), lambda r: (r, 0)),
                    pl.BlockSpec((Kp, Cp), lambda r: (0, 0)),
                ],
                out_specs=(
                    pl.BlockSpec((TR, Cp), lambda r: (r, 0)),
                    pl.BlockSpec((1, 8, Cp), lambda r: (r, 0, 0)),
                    pl.BlockSpec((1, 8, Cp), lambda r: (r, 0, 0)),
                ),
            ),
            compiler_params=cparams,
        )(patches, wmat)

        # Tiny cross-tile reduction + BN fold (scale/shift), in f32.
        total = jnp.sum(sums[:, 0, :], axis=0)
        totsq = jnp.sum(sqs[:, 0, :], axis=0)
        mean = total / R                                  # divide by REAL row count
        var = jnp.maximum(totsq / R - mean * mean, 0.0)
        inv = jax.lax.rsqrt(var + _EPS)
        scale = (lp["gamma"] * inv)[None, :]              # (1, Cp); padded cols -> 0
        shift = (lp["beta"] - mean * lp["gamma"] * inv)[None, :]

        # Pass 2: apply BN affine + LeakyReLU, tiled over rows.
        out = pl.pallas_call(
            _bn_act_kernel,
            out_shape=jax.ShapeDtypeStruct((Rp, Cp), jnp.float32),
            grid_spec=pl.GridSpec(
                grid=(nR,),
                in_specs=[
                    pl.BlockSpec((TR, Cp), lambda r: (r, 0)),
                    pl.BlockSpec((1, Cp), lambda r: (0, 0)),
                    pl.BlockSpec((1, Cp), lambda r: (0, 0)),
                ],
                out_specs=pl.BlockSpec((TR, Cp), lambda r: (r, 0)),
            ),
            compiler_params=cparams,
        )(conv, scale, shift)

    # drop row / channel padding, back to NHWC
    return out[:R, :Cout].reshape(N, Ho, Wo, Cout)


def discriminator_forward(x_nchw, prepared):
    """Equivalent of DiscriminatorNet.forward (training-mode BatchNorm)."""
    h = jnp.transpose(x_nchw, (0, 2, 3, 1))        # single NCHW -> NHWC transpose
    h = _conv_block(h, prepared[0], stride=2, pad=1, use_bn=False, act="leaky")
    h = _conv_block(h, prepared[1], stride=2, pad=1, use_bn=True, act="leaky")
    h = _conv_block(h, prepared[2], stride=2, pad=1, use_bn=True, act="leaky")
    h = _conv_block(h, prepared[3], stride=1, pad=0, use_bn=False, act="sigmoid")
    # output.view(-1, 1).squeeze(1)
    return h.reshape(-1)


def init_params(key, nc, ndf):
    ks = jax.random.split(key, 4)
    c1, c2, c3 = ndf * 2, ndf * 4, ndf * 8
    std = 0.02  # DCGAN-style init
    return {
        "w1": std * jax.random.normal(ks[0], (c1, nc, 4, 4), jnp.float32),
        "g1": jnp.ones((c1,), jnp.float32), "b1": jnp.zeros((c1,), jnp.float32),
        "w2": std * jax.random.normal(ks[1], (c2, c1, 4, 4), jnp.float32),
        "g2": jnp.ones((c2,), jnp.float32), "b2": jnp.zeros((c2,), jnp.float32),
        "w3": std * jax.random.normal(ks[2], (c3, c2, 4, 4), jnp.float32),
        "g3": jnp.ones((c3,), jnp.float32), "b3": jnp.zeros((c3,), jnp.float32),
        "w4": std * jax.random.normal(ks[3], (1, c3, 4, 4), jnp.float32),
        "g4": jnp.ones((1,), jnp.float32), "b4": jnp.zeros((1,), jnp.float32),
    }


# -------------------------- pure-JAX reference ----------------------------- #
def _ref_forward(x, params):
    def conv(h, w, s, p):
        return jax.lax.conv_general_dilated(
            h, w, (s, s), ((p, p), (p, p)),
            dimension_numbers=("NCHW", "OIHW", "NCHW"))

    def bn(h, g, b):
        mean = h.mean(axis=(0, 2, 3), keepdims=True)
        var = jnp.square(h - mean).mean(axis=(0, 2, 3), keepdims=True)
        hn = (h - mean) * jax.lax.rsqrt(var + _EPS)
        return hn * g[None, :, None, None] + b[None, :, None, None]

    def lrelu(h):
        return jnp.where(h >= 0, h, 0.2 * h)

    h = lrelu(conv(x, params["w1"], 2, 1))
    h = lrelu(bn(conv(h, params["w2"], 2, 1), params["g2"], params["b2"]))
    h = lrelu(bn(conv(h, params["w3"], 2, 1), params["g3"], params["b3"]))
    h = jax.nn.sigmoid(conv(h, params["w4"], 1, 0))
    return h.reshape(-1)


# --------------------------------- main ------------------------------------ #
if __name__ == "__main__":
    nc, ndf = 3, 4          # channels: 3 -> 8 -> 16 -> 32 -> 1
    N, H, W = 2, 32, 32     # 32 -> 16 -> 8 -> 4 -> 1 (final 4x4 valid conv)

    key = jax.random.PRNGKey(0)
    pkey, xkey = jax.random.split(key)
    raw = init_params(pkey, nc, ndf)
    prepared = prepare_params(raw)          # flatten/pad weights once
    x = jax.random.normal(xkey, (N, nc, H, W), jnp.float32)

    fwd = jax.jit(lambda xx: discriminator_forward(xx, prepared))
    out = jax.block_until_ready(fwd(x))
    assert out.shape == (N,), out.shape

    ref = jax.block_until_ready(_ref_forward(x, raw))
    # tolerance accounts for bf16 MXU inputs vs. the f32 reference
    assert jnp.allclose(out, ref, atol=2e-2, rtol=2e-2), (out, ref)

    print("KERNEL_OK")
</pallas_src>

<mosaic_0001>
module attributes {stable_mosaic.version = 11 : i64} {
  func.func @_matmul_act_kernel(%arg0: i32, %arg1: memref<512x128xbf16, #tpu.memory_space<vmem>>, %arg2: memref<128x128xbf16, #tpu.memory_space<vmem>>, %arg3: memref<512x128xf32, #tpu.memory_space<vmem>>) attributes {dimension_semantics = [#tpu.dimension_semantics<parallel>], iteration_bounds = array<i64: 1>, scalar_prefetch = 0 : i64, scratch_operands = 0 : i64, tpu.core_type = #tpu.core_type<tc>, window_params = [{transform_indices = @transform_0, window_bounds = array<i64: 512, 128>}, {pipeline_mode = #tpu.pipeline_mode<synchronous>, transform_indices = @transform_1, window_bounds = array<i64: 128, 128>}, {transform_indices = @transform_2, window_bounds = array<i64: 512, 128>}]} {
    %c0 = arith.constant 0 : index
    %c0_0 = arith.constant 0 : index
    %0 = vector.load %arg1[%c0, %c0_0] : memref<512x128xbf16, #tpu.memory_space<vmem>>, vector<512x128xbf16>
    %c0_1 = arith.constant 0 : index
    %c0_2 = arith.constant 0 : index
    %1 = vector.load %arg2[%c0_1, %c0_2] : memref<128x128xbf16, #tpu.memory_space<vmem>>, vector<128x128xbf16>
    %cst = arith.constant dense<0.000000e+00> : vector<512x128xf32>
    %2 = tpu.matmul %0, %1, %cst {dimension_numbers = #tpu.dot_dimension_numbers<[1], [0], [0], [1], [0, 0, 1, 1], [], []>} : vector<512x128xbf16>, vector<128x128xbf16>, vector<512x128xf32> -> vector<512x128xf32>
    %cst_3 = arith.constant 0.000000e+00 : f32
    %3 = vector.broadcast %cst_3 : f32 to vector<512x128xf32>
    %4 = arith.cmpf oge, %2, %3 : vector<512x128xf32>
    %cst_4 = arith.constant 2.000000e-01 : f32
    %5 = vector.broadcast %cst_4 : f32 to vector<512x128xf32>
    %6 = arith.mulf %5, %2 : vector<512x128xf32>
    %7 = arith.select %4, %2, %6 : vector<512x128xi1>, vector<512x128xf32>
    %c0_5 = arith.constant 0 : index
    %c0_6 = arith.constant 0 : index
    %8 = vector.load %arg3[%c0_5, %c0_6] : memref<512x128xf32, #tpu.memory_space<vmem>>, vector<512x128xf32>
    tpu.vector_store %arg3[%c0_5, %c0_6], %7 {strides = array<i32>} : memref<512x128xf32, #tpu.memory_space<vmem>>, vector<512x128xf32>,
    return
  }
  func.func @transform_0(%arg0: i32) -> (i32, i32) {
    %c0_i32 = arith.constant 0 : i32
    %c0_i32_0 = arith.constant 0 : i32
    return %arg0, %c0_i32 : i32, i32
  }
  func.func @transform_1(%arg0: i32) -> (i32, i32) {
    %c0_i32 = arith.constant 0 : i32
    %c0_i32_0 = arith.constant 0 : i32
    %c0_i32_1 = arith.constant 0 : i32
    return %c0_i32, %c0_i32_0 : i32, i32
  }
  func.func @transform_2(%arg0: i32) -> (i32, i32) {
    %c0_i32 = arith.constant 0 : i32
    %c0_i32_0 = arith.constant 0 : i32
    return %arg0, %c0_i32 : i32, i32
  }
}

module attributes {stable_mosaic.version = 11 : i64} {
  func.func @_matmul_stats_kernel(%arg0: i32, %arg1: memref<128x128xbf16, #tpu.memory_space<vmem>>, %arg2: memref<128x128xbf16, #tpu.memory_space<vmem>>, %arg3: memref<128x128xf32, #tpu.memory_space<vmem>>, %arg4: memref<1x8x128xf32, #tpu.memory_space<vmem>>, %arg5: memref<1x8x128xf32, #tpu.memory_space<vmem>>) attributes {dimension_semantics = [#tpu.dimension_semantics<parallel>], iteration_bounds = array<i64: 1>, scalar_prefetch = 0 : i64, scratch_operands = 0 : i64, tpu.core_type = #tpu.core_type<tc>, window_params = [{transform_indices = @transform_0, window_bounds = array<i64: 128, 128>}, {pipeline_mode = #tpu.pipeline_mode<synchronous>, transform_indices = @transform_1, window_bounds = array<i64: 128, 128>}, {transform_indices = @transform_2, window_bounds = array<i64: 128, 128>}, {transform_indices = @transform_3, window_bounds = array<i64: 1, 8, 128>}, {transform_indices = @transform_4, window_bounds = array<i64: 1, 8, 128>}]} {
    %c0 = arith.constant 0 : index
    %c0_0 = arith.constant 0 : index
    %0 = vector.load %arg1[%c0, %c0_0] : memref<128x128xbf16, #tpu.memory_space<vmem>>, vector<128x128xbf16>
    %c0_1 = arith.constant 0 : index
    %c0_2 = arith.constant 0 : index
    %1 = vector.load %arg2[%c0_1, %c0_2] : memref<128x128xbf16, #tpu.memory_space<vmem>>, vector<128x128xbf16>
    %cst = arith.constant dense<0.000000e+00> : vector<128x128xf32>
    %2 = tpu.matmul %0, %1, %cst {dimension_numbers = #tpu.dot_dimension_numbers<[1], [0], [0], [1], [0, 0, 1, 1], [], []>} : vector<128x128xbf16>, vector<128x128xbf16>, vector<128x128xf32> -> vector<128x128xf32>
    %c0_3 = arith.constant 0 : index
    %c0_4 = arith.constant 0 : index
    %3 = vector.load %arg3[%c0_3, %c0_4] : memref<128x128xf32, #tpu.memory_space<vmem>>, vector<128x128xf32>
    tpu.vector_store %arg3[%c0_3, %c0_4], %2 {strides = array<i32>} : memref<128x128xf32, #tpu.memory_space<vmem>>, vector<128x128xf32>,
    %cst_5 = arith.constant dense<0.000000e+00> : vector<128xf32>
    %4 = vector.multi_reduction <add>, %2, %cst_5 [0] : vector<128x128xf32> to vector<128xf32>
    %5 = vector.shape_cast %4 : vector<128xf32> to vector<1x1x128xf32>
    %6 = vector.broadcast %5 : vector<1x1x128xf32> to vector<1x8x128xf32>
    %c0_6 = arith.constant 0 : index
    %c0_7 = arith.constant 0 : index
    %c0_8 = arith.constant 0 : index
    %7 = vector.load %arg4[%c0_6, %c0_7, %c0_8] : memref<1x8x128xf32, #tpu.memory_space<vmem>>, vector<1x8x128xf32>
    tpu.vector_store %arg4[%c0_6, %c0_7, %c0_8], %6 {strides = array<i32>} : memref<1x8x128xf32, #tpu.memory_space<vmem>>, vector<1x8x128xf32>,
    %8 = arith.mulf %2, %2 : vector<128x128xf32>
    %cst_9 = arith.constant dense<0.000000e+00> : vector<128xf32>
    %9 = vector.multi_reduction <add>, %8, %cst_9 [0] : vector<128x128xf32> to vector<128xf32>
    %10 = vector.shape_cast %9 : vector<128xf32> to vector<1x1x128xf32>
    %11 = vector.broadcast %10 : vector<1x1x128xf32> to vector<1x8x128xf32>
    %c0_10 = arith.constant 0 : index
    %c0_11 = arith.constant 0 : index
    %c0_12 = arith.constant 0 : index
    %12 = vector.load %arg5[%c0_10, %c0_11, %c0_12] : memref<1x8x128xf32, #tpu.memory_space<vmem>>, vector<1x8x128xf32>
    tpu.vector_store %arg5[%c0_10, %c0_11, %c0_12], %11 {strides = array<i32>} : memref<1x8x128xf32, #tpu.memory_space<vmem>>, vector<1x8x128xf32>,
    return
  }
  func.func @transform_0(%arg0: i32) -> (i32, i32) {
    %c0_i32 = arith.constant 0 : i32
    %c0_i32_0 = arith.constant 0 : i32
    return %arg0, %c0_i32 : i32, i32
  }
  func.func @transform_1(%arg0: i32) -> (i32, i32) {
    %c0_i32 = arith.constant 0 : i32
    %c0_i32_0 = arith.constant 0 : i32
    %c0_i32_1 = arith.constant 0 : i32
    return %c0_i32, %c0_i32_0 : i32, i32
  }
  func.func @transform_2(%arg0: i32) -> (i32, i32) {
    %c0_i32 = arith.constant 0 : i32
    %c0_i32_0 = arith.constant 0 : i32
    return %arg0, %c0_i32 : i32, i32
  }
  func.func @transform_3(%arg0: i32) -> (i32, i32, i32) {
    %c0_i32 = arith.constant 0 : i32
    %c0_i32_0 = arith.constant 0 : i32
    %c0_i32_1 = arith.constant 0 : i32
    return %arg0, %c0_i32, %c0_i32_0 : i32, i32, i32
  }
  func.func @transform_4(%arg0: i32) -> (i32, i32, i32) {
    %c0_i32 = arith.constant 0 : i32
    %c0_i32_0 = arith.constant 0 : i32
    %c0_i32_1 = arith.constant 0 : i32
    return %arg0, %c0_i32, %c0_i32_0 : i32, i32, i32
  }
}

module attributes {stable_mosaic.version = 11 : i64} {
  func.func @_bn_act_kernel(%arg0: i32, %arg1: memref<128x128xf32, #tpu.memory_space<vmem>>, %arg2: memref<1x128xf32, #tpu.memory_space<vmem>>, %arg3: memref<1x128xf32, #tpu.memory_space<vmem>>, %arg4: memref<128x128xf32, #tpu.memory_space<vmem>>) attributes {dimension_semantics = [#tpu.dimension_semantics<parallel>], iteration_bounds = array<i64: 1>, scalar_prefetch = 0 : i64, scratch_operands = 0 : i64, tpu.core_type = #tpu.core_type<tc>, window_params = [{transform_indices = @transform_0, window_bounds = array<i64: 128, 128>}, {pipeline_mode = #tpu.pipeline_mode<synchronous>, transform_indices = @transform_1, window_bounds = array<i64: 1, 128>}, {pipeline_mode = #tpu.pipeline_mode<synchronous>, transform_indices = @transform_2, window_bounds = array<i64: 1, 128>}, {transform_indices = @transform_3, window_bounds = array<i64: 128, 128>}]} {
    %c0 = arith.constant 0 : index
    %c0_0 = arith.constant 0 : index
    %0 = vector.load %arg1[%c0, %c0_0] : memref<128x128xf32, #tpu.memory_space<vmem>>, vector<128x128xf32>
    %c0_1 = arith.constant 0 : index
    %c0_2 = arith.constant 0 : index
    %1 = vector.load %arg2[%c0_1, %c0_2] : memref<1x128xf32, #tpu.memory_space<vmem>>, vector<1x128xf32>
    %2 = vector.broadcast %1 : vector<1x128xf32> to vector<128x128xf32>
    %3 = arith.mulf %0, %2 : vector<128x128xf32>
    %c0_3 = arith.constant 0 : index
    %c0_4 = arith.constant 0 : index
    %4 = vector.load %arg3[%c0_3, %c0_4] : memref<1x128xf32, #tpu.memory_space<vmem>>, vector<1x128xf32>
    %5 = vector.broadcast %4 : vector<1x128xf32> to vector<128x128xf32>
    %6 = arith.addf %3, %5 : vector<128x128xf32>
    %cst = arith.constant 0.000000e+00 : f32
    %7 = vector.broadcast %cst : f32 to vector<128x128xf32>
    %8 = arith.cmpf oge, %6, %7 : vector<128x128xf32>
    %cst_5 = arith.constant 2.000000e-01 : f32
    %9 = vector.broadcast %cst_5 : f32 to vector<128x128xf32>
    %10 = arith.mulf %9, %6 : vector<128x128xf32>
    %11 = arith.select %8, %6, %10 : vector<128x128xi1>, vector<128x128xf32>
    %c0_6 = arith.constant 0 : index
    %c0_7 = arith.constant 0 : index
    %12 = vector.load %arg4[%c0_6, %c0_7] : memref<128x128xf32, #tpu.memory_space<vmem>>, vector<128x128xf32>
    tpu.vector_store %arg4[%c0_6, %c0_7], %11 {strides = array<i32>} : memref<128x128xf32, #tpu.memory_space<vmem>>, vector<128x128xf32>,
    return
  }
  func.func @transform_0(%arg0: i32) -> (i32, i32) {
    %c0_i32 = arith.constant 0 : i32
    %c0_i32_0 = arith.constant 0 : i32
    return %arg0, %c0_i32 : i32, i32
  }
  func.func @transform_1(%arg0: i32) -> (i32, i32) {
    %c0_i32 = arith.constant 0 : i32
    %c0_i32_0 = arith.constant 0 : i32
    %c0_i32_1 = arith.constant 0 : i32
    return %c0_i32, %c0_i32_0 : i32, i32
  }
  func.func @transform_2(%arg0: i32) -> (i32, i32) {
    %c0_i32 = arith.constant 0 : i32
    %c0_i32_0 = arith.constant 0 : i32
    %c0_i32_1 = arith.constant 0 : i32
    return %c0_i32, %c0_i32_0 : i32, i32
  }
  func.func @transform_3(%arg0: i32) -> (i32, i32) {
    %c0_i32 = arith.constant 0 : i32
    %c0_i32_0 = arith.constant 0 : i32
    return %arg0, %c0_i32 : i32, i32
  }
}

module attributes {stable_mosaic.version = 11 : i64} {
  func.func @_matmul_stats_kernel(%arg0: i32, %arg1: memref<32x256xbf16, #tpu.memory_space<vmem>>, %arg2: memref<256x128xbf16, #tpu.memory_space<vmem>>, %arg3: memref<32x128xf32, #tpu.memory_space<vmem>>, %arg4: memref<1x8x128xf32, #tpu.memory_space<vmem>>, %arg5: memref<1x8x128xf32, #tpu.memory_space<vmem>>) attributes {dimension_semantics = [#tpu.dimension_semantics<parallel>], iteration_bounds = array<i64: 1>, scalar_prefetch = 0 : i64, scratch_operands = 0 : i64, tpu.core_type = #tpu.core_type<tc>, window_params = [{transform_indices = @transform_0, window_bounds = array<i64: 32, 256>}, {pipeline_mode = #tpu.pipeline_mode<synchronous>, transform_indices = @transform_1, window_bounds = array<i64: 256, 128>}, {transform_indices = @transform_2, window_bounds = array<i64: 32, 128>}, {transform_indices = @transform_3, window_bounds = array<i64: 1, 8, 128>}, {transform_indices = @transform_4, window_bounds = array<i64: 1, 8, 128>}]} {
    %c0 = arith.constant 0 : index
    %c0_0 = arith.constant 0 : index
    %0 = vector.load %arg1[%c0, %c0_0] : memref<32x256xbf16, #tpu.memory_space<vmem>>, vector<32x256xbf16>
    %c0_1 = arith.constant 0 : index
    %c0_2 = arith.constant 0 : index
    %1 = vector.load %arg2[%c0_1, %c0_2] : memref<256x128xbf16, #tpu.memory_space<vmem>>, vector<256x128xbf16>
    %cst = arith.constant dense<0.000000e+00> : vector<32x128xf32>
    %2 = tpu.matmul %0, %1, %cst {dimension_numbers = #tpu.dot_dimension_numbers<[1], [0], [0], [1], [0, 0, 1, 1], [], []>} : vector<32x256xbf16>, vector<256x128xbf16>, vector<32x128xf32> -> vector<32x128xf32>
    %c0_3 = arith.constant 0 : index
    %c0_4 = arith.constant 0 : index
    %3 = vector.load %arg3[%c0_3, %c0_4] : memref<32x128xf32, #tpu.memory_space<vmem>>, vector<32x128xf32>
    tpu.vector_store %arg3[%c0_3, %c0_4], %2 {strides = array<i32>} : memref<32x128xf32, #tpu.memory_space<vmem>>, vector<32x128xf32>,
    %cst_5 = arith.constant dense<0.000000e+00> : vector<128xf32>
    %4 = vector.multi_reduction <add>, %2, %cst_5 [0] : vector<32x128xf32> to vector<128xf32>
    %5 = vector.shape_cast %4 : vector<128xf32> to vector<1x1x128xf32>
    %6 = vector.broadcast %5 : vector<1x1x128xf32> to vector<1x8x128xf32>
    %c0_6 = arith.constant 0 : index
    %c0_7 = arith.constant 0 : index
    %c0_8 = arith.constant 0 : index
    %7 = vector.load %arg4[%c0_6, %c0_7, %c0_8] : memref<1x8x128xf32, #tpu.memory_space<vmem>>, vector<1x8x128xf32>
    tpu.vector_store %arg4[%c0_6, %c0_7, %c0_8], %6 {strides = array<i32>} : memref<1x8x128xf32, #tpu.memory_space<vmem>>, vector<1x8x128xf32>,
    %8 = arith.mulf %2, %2 : vector<32x128xf32>
    %cst_9 = arith.constant dense<0.000000e+00> : vector<128xf32>
    %9 = vector.multi_reduction <add>, %8, %cst_9 [0] : vector<32x128xf32> to vector<128xf32>
    %10 = vector.shape_cast %9 : vector<128xf32> to vector<1x1x128xf32>
    %11 = vector.broadcast %10 : vector<1x1x128xf32> to vector<1x8x128xf32>
    %c0_10 = arith.constant 0 : index
    %c0_11 = arith.constant 0 : index
    %c0_12 = arith.constant 0 : index
    %12 = vector.load %arg5[%c0_10, %c0_11, %c0_12] : memref<1x8x128xf32, #tpu.memory_space<vmem>>, vector<1x8x128xf32>
    tpu.vector_store %arg5[%c0_10, %c0_11, %c0_12], %11 {strides = array<i32>} : memref<1x8x128xf32, #tpu.memory_space<vmem>>, vector<1x8x128xf32>,
    return
  }
  func.func @transform_0(%arg0: i32) -> (i32, i32) {
    %c0_i32 = arith.constant 0 : i32
    %c0_i32_0 = arith.constant 0 : i32
    return %arg0, %c0_i32 : i32, i32
  }
  func.func @transform_1(%arg0: i32) -> (i32, i32) {
    %c0_i32 = arith.constant 0 : i32
    %c0_i32_0 = arith.constant 0 : i32
    %c0_i32_1 = arith.constant 0 : i32
    return %c0_i32, %c0_i32_0 : i32, i32
  }
  func.func @transform_2(%arg0: i32) -> (i32, i32) {
    %c0_i32 = arith.constant 0 : i32
    %c0_i32_0 = arith.constant 0 : i32
    return %arg0, %c0_i32 : i32, i32
  }
  func.func @transform_3(%arg0: i32) -> (i32, i32, i32) {
    %c0_i32 = arith.constant 0 : i32
    %c0_i32_0 = arith.constant 0 : i32
    %c0_i32_1 = arith.constant 0 : i32
    return %arg0, %c0_i32, %c0_i32_0 : i32, i32, i32
  }
  func.func @transform_4(%arg0: i32) -> (i32, i32, i32) {
    %c0_i32 = arith.constant 0 : i32
    %c0_i32_0 = arith.constant 0 : i32
    %c0_i32_1 = arith.constant 0 : i32
    return %arg0, %c0_i32, %c0_i32_0 : i32, i32, i32
  }
}

module attributes {stable_mosaic.version = 11 : i64} {
  func.func @_bn_act_kernel(%arg0: i32, %arg1: memref<32x128xf32, #tpu.memory_space<vmem>>, %arg2: memref<1x128xf32, #tpu.memory_space<vmem>>, %arg3: memref<1x128xf32, #tpu.memory_space<vmem>>, %arg4: memref<32x128xf32, #tpu.memory_space<vmem>>) attributes {dimension_semantics = [#tpu.dimension_semantics<parallel>], iteration_bounds = array<i64: 1>, scalar_prefetch = 0 : i64, scratch_operands = 0 : i64, tpu.core_type = #tpu.core_type<tc>, window_params = [{transform_indices = @transform_0, window_bounds = array<i64: 32, 128>}, {pipeline_mode = #tpu.pipeline_mode<synchronous>, transform_indices = @transform_1, window_bounds = array<i64: 1, 128>}, {pipeline_mode = #tpu.pipeline_mode<synchronous>, transform_indices = @transform_2, window_bounds = array<i64: 1, 128>}, {transform_indices = @transform_3, window_bounds = array<i64: 32, 128>}]} {
    %c0 = arith.constant 0 : index
    %c0_0 = arith.constant 0 : index
    %0 = vector.load %arg1[%c0, %c0_0] : memref<32x128xf32, #tpu.memory_space<vmem>>, vector<32x128xf32>
    %c0_1 = arith.constant 0 : index
    %c0_2 = arith.constant 0 : index
    %1 = vector.load %arg2[%c0_1, %c0_2] : memref<1x128xf32, #tpu.memory_space<vmem>>, vector<1x128xf32>
    %2 = vector.broadcast %1 : vector<1x128xf32> to vector<32x128xf32>
    %3 = arith.mulf %0, %2 : vector<32x128xf32>
    %c0_3 = arith.constant 0 : index
    %c0_4 = arith.constant 0 : index
    %4 = vector.load %arg3[%c0_3, %c0_4] : memref<1x128xf32, #tpu.memory_space<vmem>>, vector<1x128xf32>
    %5 = vector.broadcast %4 : vector<1x128xf32> to vector<32x128xf32>
    %6 = arith.addf %3, %5 : vector<32x128xf32>
    %cst = arith.constant 0.000000e+00 : f32
    %7 = vector.broadcast %cst : f32 to vector<32x128xf32>
    %8 = arith.cmpf oge, %6, %7 : vector<32x128xf32>
    %cst_5 = arith.constant 2.000000e-01 : f32
    %9 = vector.broadcast %cst_5 : f32 to vector<32x128xf32>
    %10 = arith.mulf %9, %6 : vector<32x128xf32>
    %11 = arith.select %8, %6, %10 : vector<32x128xi1>, vector<32x128xf32>
    %c0_6 = arith.constant 0 : index
    %c0_7 = arith.constant 0 : index
    %12 = vector.load %arg4[%c0_6, %c0_7] : memref<32x128xf32, #tpu.memory_space<vmem>>, vector<32x128xf32>
    tpu.vector_store %arg4[%c0_6, %c0_7], %11 {strides = array<i32>} : memref<32x128xf32, #tpu.memory_space<vmem>>, vector<32x128xf32>,
    return
  }
  func.func @transform_0(%arg0: i32) -> (i32, i32) {
    %c0_i32 = arith.constant 0 : i32
    %c0_i32_0 = arith.constant 0 : i32
    return %arg0, %c0_i32 : i32, i32
  }
  func.func @transform_1(%arg0: i32) -> (i32, i32) {
    %c0_i32 = arith.constant 0 : i32
    %c0_i32_0 = arith.constant 0 : i32
    %c0_i32_1 = arith.constant 0 : i32
    return %c0_i32, %c0_i32_0 : i32, i32
  }
  func.func @transform_2(%arg0: i32) -> (i32, i32) {
    %c0_i32 = arith.constant 0 : i32
    %c0_i32_0 = arith.constant 0 : i32
    %c0_i32_1 = arith.constant 0 : i32
    return %c0_i32, %c0_i32_0 : i32, i32
  }
  func.func @transform_3(%arg0: i32) -> (i32, i32) {
    %c0_i32 = arith.constant 0 : i32
    %c0_i32_0 = arith.constant 0 : i32
    return %arg0, %c0_i32 : i32, i32
  }
}

module attributes {stable_mosaic.version = 11 : i64} {
  func.func @_matmul_act_kernel(%arg0: i32, %arg1: memref<8x512xbf16, #tpu.memory_space<vmem>>, %arg2: memref<512x128xbf16, #tpu.memory_space<vmem>>, %arg3: memref<8x128xf32, #tpu.memory_space<vmem>>) attributes {dimension_semantics = [#tpu.dimension_semantics<parallel>], iteration_bounds = array<i64: 1>, scalar_prefetch = 0 : i64, scratch_operands = 0 : i64, tpu.core_type = #tpu.core_type<tc>, window_params = [{transform_indices = @transform_0, window_bounds = array<i64: 8, 512>}, {pipeline_mode = #tpu.pipeline_mode<synchronous>, transform_indices = @transform_1, window_bounds = array<i64: 512, 128>}, {transform_indices = @transform_2, window_bounds = array<i64: 8, 128>}]} {
    %c0 = arith.constant 0 : index
    %c0_0 = arith.constant 0 : index
    %0 = vector.load %arg1[%c0, %c0_0] : memref<8x512xbf16, #tpu.memory_space<vmem>>, vector<8x512xbf16>
    %c0_1 = arith.constant 0 : index
    %c0_2 = arith.constant 0 : index
    %1 = vector.load %arg2[%c0_1, %c0_2] : memref<512x128xbf16, #tpu.memory_space<vmem>>, vector<512x128xbf16>
    %cst = arith.constant dense<0.000000e+00> : vector<8x128xf32>
    %2 = tpu.matmul %0, %1, %cst {dimension_numbers = #tpu.dot_dimension_numbers<[1], [0], [0], [1], [0, 0, 1, 1], [], []>} : vector<8x512xbf16>, vector<512x128xbf16>, vector<8x128xf32> -> vector<8x128xf32>
    %3 = arith.negf %2 : vector<8x128xf32>
    %4 = math.exp %3 : vector<8x128xf32>
    %cst_3 = arith.constant 1.000000e+00 : f32
    %5 = vector.broadcast %cst_3 : f32 to vector<8x128xf32>
    %6 = arith.addf %5, %4 : vector<8x128xf32>
    %7 = arith.divf %5, %6 : vector<8x128xf32>
    %c0_4 = arith.constant 0 : index
    %c0_5 = arith.constant 0 : index
    %8 = vector.load %arg3[%c0_4, %c0_5] : memref<8x128xf32, #tpu.memory_space<vmem>>, vector<8x128xf32>
    tpu.vector_store %arg3[%c0_4, %c0_5], %7 {strides = array<i32>} : memref<8x128xf32, #tpu.memory_space<vmem>>, vector<8x128xf32>,
    return
  }
  func.func @transform_0(%arg0: i32) -> (i32, i32) {
    %c0_i32 = arith.constant 0 : i32
    %c0_i32_0 = arith.constant 0 : i32
    return %arg0, %c0_i32 : i32, i32
  }
  func.func @transform_1(%arg0: i32) -> (i32, i32) {
    %c0_i32 = arith.constant 0 : i32
    %c0_i32_0 = arith.constant 0 : i32
    %c0_i32_1 = arith.constant 0 : i32
    return %c0_i32, %c0_i32_0 : i32, i32
  }
  func.func @transform_2(%arg0: i32) -> (i32, i32) {
    %c0_i32 = arith.constant 0 : i32
    %c0_i32_0 = arith.constant 0 : i32
    return %arg0, %c0_i32 : i32, i32
  }
}

</mosaic_0001>

<bundles_post_ra>
// kernel: _lambda_.6
= control target key start
LH: loop header
LB: loop body
LE: loop exit
PB: predicated region body
PF: predicated region fallthrough
CT: control target
= control target key end

     0   :  { %s1424_s1 = inlined_call_operand.vmem [shape: bf16[128,128], index: 1, kind: input, shape index: {}]   ;;  %s1425_s0 = inlined_call_operand.vmem [shape: bf16[512,128], index: 0, kind: input, shape index: {}]   ;;  %s1426_s2 = inlined_call_operand.vmem [shape: f32[512,128], index: 2, kind: output, shape index: {}]  }
   0x1   :  { %v1057_v0 = vld [vmem:[%s1424_s1 + $0x38] sm:$0xff]   ;;  %v1058_v1 = vld [vmem:[%s1424_s1 + $0x30] sm:$0xff]   ;;  %v1059_v2 = vld [vmem:[%s1424_s1 + $0x28] sm:$0xff]  }
   0x2   :  { %961 = vmatprep.subr.bf16.mxu0 %v1057_v0  ;;  %1041 = vmatprep.subr.bf16.mxu1 %v1057_v0  ;;  %v1060_v3 = vld [vmem:[%s1424_s1 + $0x20] sm:$0xff]   ;;  %v1061_v6 = vld [vmem:[%s1424_s1 + $0x18] sm:$0xff]   ;;  %v1062_v7 = vld [vmem:[%s1424_s1 + $0x10] sm:$0xff]  }
   0x3   :  { %962 = vmatpush3.bf16.msra.mxu0 %v1057_v0  ;;  %1049 = vmatpush3.bf16.msra.mxu1 %v1057_v0  ;;  %v1065_v4 = vld [vmem:[%s1425_s0] sm:$0xff]   ;;  %v1063_v8 = vld [vmem:[%s1424_s1 + $0x8] sm:$0xff]   ;;  %v1069_v12 = vld [vmem:[%s1425_s0 + $0x10] sm:$0xff]  }
   0x4   :  { %963 = vmatprep.subr.bf16.mxu0 %v1058_v1  ;;  %1042 = vmatprep.subr.bf16.mxu1 %v1058_v1  ;;  %v1066_v5 = vld [vmem:[%s1425_s0 + $0x80] sm:$0xff]   ;;  %v1067_v10 = vld [vmem:[%s1425_s0 + $0x8] sm:$0xff]   ;;  %v1070_v13 = vld [vmem:[%s1425_s0 + $0x90] sm:$0xff]  }
   0x5   :  { %977 = vmatprep.mubr.bf16.mxu0 %v1065_v4  ;;  %1009 = vmatprep.mubr.bf16.mxu1 %v1066_v5  ;;  %v1064_v9 = vld [vmem:[%s1424_s1] sm:$0xff]   ;;  %v1068_v11 = vld [vmem:[%s1425_s0 + $0x88] sm:$0xff]   ;;  %v1071_v14 = vld [vmem:[%s1425_s0 + $0x18] sm:$0xff]  }
   0x6   :  { %v1072_v15 = vld [vmem:[%s1425_s0 + $0x98] sm:$0xff]   ;;  %v1073_v16 = vld [vmem:[%s1425_s0 + $0x20] sm:$0xff]   ;;  %v1075_v18 = vld [vmem:[%s1425_s0 + $0x28] sm:$0xff]  }
   0x7   :  { %964 = vmatpush3.bf16.msra.mxu0 %v1058_v1  ;;  %1050 = vmatpush3.bf16.msra.mxu1 %v1058_v1  ;;  %v1074_v17 = vld [vmem:[%s1425_s0 + $0xa0] sm:$0xff]   ;;  %v1076_v19 = vld [vmem:[%s1425_s0 + $0xa8] sm:$0xff]   ;;  %v1077_v20 = vld [vmem:[%s1425_s0 + $0x30] sm:$0xff]  }
   0x8   :  { %965 = vmatprep.subr.bf16.mxu0 %v1059_v2  ;;  %1043 = vmatprep.subr.bf16.mxu1 %v1059_v2  ;;  %v1078_v21 = vld [vmem:[%s1425_s0 + $0xb0] sm:$0xff]   ;;  %v1079_v22 = vld [vmem:[%s1425_s0 + $0x38] sm:$0xff]   ;;  %v1081_v24 = vld [vmem:[%s1425_s0 + $0x40] sm:$0xff]  }
   0x9   :  { %v1080_v23 = vld [vmem:[%s1425_s0 + $0xb8] sm:$0xff]   ;;  %v1082_v25 = vld [vmem:[%s1425_s0 + $0xc0] sm:$0xff]   ;;  %v1083_v26 = vld [vmem:[%s1425_s0 + $0x48] sm:$0xff]  }
   0xa   :  { %v1084_v27 = vld [vmem:[%s1425_s0 + $0xc8] sm:$0xff]   ;;  %v1085_v28 = vld [vmem:[%s1425_s0 + $0x50] sm:$0xff]   ;;  %v1087_v30 = vld [vmem:[%s1425_s0 + $0x58] sm:$0xff]  }
   0xb   :  { %966 = vmatpush3.bf16.msra.mxu0 %v1059_v2  ;;  %1051 = vmatpush3.bf16.msra.mxu1 %v1059_v2  ;;  %v1086_v29 = vld [vmem:[%s1425_s0 + $0xd0] sm:$0xff]   ;;  %v1088_v31 = vld [vmem:[%s1425_s0 + $0xd8] sm:$0xff]   ;;  %v1089_v32 = vld [vmem:[%s1425_s0 + $0x60] sm:$0xff]  }
   0xc   :  { %967 = vmatprep.subr.bf16.mxu0 %v1060_v3  ;;  %1044 = vmatprep.subr.bf16.mxu1 %v1060_v3  ;;  %v1090_v33 = vld [vmem:[%s1425_s0 + $0xe0] sm:$0xff]   ;;  %v1091_v34 = vld [vmem:[%s1425_s0 + $0x68] sm:$0xff]   ;;  %v1093_v36 = vld [vmem:[%s1425_s0 + $0x70] sm:$0xff]  }
   0xd   :  { %v1092_v35 = vld [vmem:[%s1425_s0 + $0xe8] sm:$0xff]   ;;  %v1094_v37 = vld [vmem:[%s1425_s0 + $0xf0] sm:$0xff]   ;;  %v1095_v38 = vld [vmem:[%s1425_s0 + $0x78] sm:$0xff]  }
   0xe   :  { %v1096_v39 = vld [vmem:[%s1425_s0 + $0xf8] sm:$0xff]  }
   0xf   :  { %968 = vmatpush3.bf16.msra.mxu0 %v1060_v3  ;;  %1052 = vmatpush3.bf16.msra.mxu1 %v1060_v3 }
  0x10   :  { %969 = vmatprep.subr.bf16.mxu0 %v1061_v6  ;;  %1045 = vmatprep.subr.bf16.mxu1 %v1061_v6 }
  0x13   :  { %970 = vmatpush3.bf16.msra.mxu0 %v1061_v6  ;;  %1053 = vmatpush3.bf16.msra.mxu1 %v1061_v6 }
  0x14   :  { %971 = vmatprep.subr.bf16.mxu0 %v1062_v7  ;;  %1046 = vmatprep.subr.bf16.mxu1 %v1062_v7 }
  0x17   :  { %972 = vmatpush3.bf16.msra.mxu0 %v1062_v7  ;;  %1054 = vmatpush3.bf16.msra.mxu1 %v1062_v7 }
  0x18   :  { %973 = vmatprep.subr.bf16.mxu0 %v1063_v8  ;;  %1047 = vmatprep.subr.bf16.mxu1 %v1063_v8 }
  0x1b   :  { %974 = vmatpush3.bf16.msra.mxu0 %v1063_v8  ;;  %1055 = vmatpush3.bf16.msra.mxu1 %v1063_v8 }
  0x1c   :  { %975 = vmatprep.subr.bf16.mxu0 %v1064_v9  ;;  %1048 = vmatprep.subr.bf16.mxu1 %v1064_v9 }
  0x1f   :  { %976 = vmatpush3.bf16.msra.mxu0 %v1064_v9  ;;  %1056 = vmatpush3.bf16.msra.mxu1 %v1064_v9 }
  0x22   :  { %978 = vmatmul.mubr.bf16.vlgmr.msra.gmra.mxu0 %v1067_v10  ;;  %1010 = vmatmul.mubr.bf16.vlgmr.msra.gmra.mxu1 %v1068_v11 }
  0x23   :  { %981 = vmatprep.mubr.bf16.mxu0 %v1069_v12  ;;  %1013 = vmatprep.mubr.bf16.mxu1 %v1070_v13 }
  0x2a   :  { %982 = vmatmul.mubr.bf16.gmra.mxu0 %v1071_v14  ;;  %1014 = vmatmul.mubr.bf16.gmra.mxu1 %v1072_v15 }
  0x2b   :  { %985 = vmatprep.mubr.bf16.mxu0 %v1073_v16  ;;  %1017 = vmatprep.mubr.bf16.mxu1 %v1074_v17 }
  0x32   :  { %986 = vmatmul.mubr.bf16.gmra.mxu0 %v1075_v18  ;;  %1018 = vmatmul.mubr.bf16.gmra.mxu1 %v1076_v19 }
  0x33   :  { %989 = vmatprep.mubr.bf16.mxu0 %v1077_v20  ;;  %1021 = vmatprep.mubr.bf16.mxu1 %v1078_v21 }
  0x3a   :  { %990 = vmatmul.mubr.bf16.gmra.mxu0 %v1079_v22  ;;  %1022 = vmatmul.mubr.bf16.gmra.mxu1 %v1080_v23 }
  0x3b   :  { %993 = vmatprep.mubr.bf16.mxu0 %v1081_v24  ;;  %1025 = vmatprep.mubr.bf16.mxu1 %v1082_v25 }
  0x42   :  { %994 = vmatmul.mubr.bf16.gmra.mxu0 %v1083_v26  ;;  %1026 = vmatmul.mubr.bf16.gmra.mxu1 %v1084_v27 }
  0x43   :  { %997 = vmatprep.mubr.bf16.mxu0 %v1085_v28  ;;  %1029 = vmatprep.mubr.bf16.mxu1 %v1086_v29 }
  0x4a   :  { %998 = vmatmul.mubr.bf16.gmra.mxu0 %v1087_v30  ;;  %1030 = vmatmul.mubr.bf16.gmra.mxu1 %v1088_v31 }
  0x4b   :  { %1001 = vmatprep.mubr.bf16.mxu0 %v1089_v32  ;;  %1033 = vmatprep.mubr.bf16.mxu1 %v1090_v33 }
  0x52   :  { %1002 = vmatmul.mubr.bf16.gmra.mxu0 %v1091_v34  ;;  %1034 = vmatmul.mubr.bf16.gmra.mxu1 %v1092_v35 }
  0x53   :  { %1005 = vmatprep.mubr.bf16.mxu0 %v1093_v36  ;;  %1037 = vmatprep.mubr.bf16.mxu1 %v1094_v37 }
  0x5a   :  { %1006 = vmatmul.mubr.bf16.gmra.mxu0 %v1095_v38  ;;  %1038 = vmatmul.mubr.bf16.gmra.mxu1 %v1096_v39 }
  0xe2   :  { %v979_v40 = vpop.f32.mrf.mxu0  ;;  %v1011_v41 = vpop.f32.mrf.mxu1 }
  0xe3   :  { %vm623_vm0 = vcmp.ge.f32.partialorder %v979_v40, 0.0  ;;  %v687_v42 = vmul.f32 0.2, %v979_v40  ;;  %vm655_vm1 = vcmp.ge.f32.partialorder %v1011_v41, 0.0  ;;  %v719_v43 = vmul.f32 0.2, %v1011_v41 }
  0xe4   :  { %v366_v44 = vpop.f32.mrf.mxu0  ;;  %v494_v45 = vpop.f32.mrf.mxu1 }
  0xe5   :  { %v751_v46 = vsel %vm623_vm0, %v979_v40, %v687_v42  ;;  %v783_v47 = vsel %vm655_vm1, %v1011_v41, %v719_v43  ;;  %vm621_vm2 = vcmp.ge.f32.partialorder %v366_v44, 0.0  ;;  %v685_v48 = vmul.f32 0.2, %v366_v44 }
  0xe6   :  { %815 = vst [vmem:[%s1426_s2 + $0x10] sm:$0xff] %v751_v46  ;;  %847 = vst [vmem:[%s1426_s2 + $0x110] sm:$0xff] %v783_v47  ;;  %vm653_vm3 = vcmp.ge.f32.partialorder %v494_v45, 0.0  ;;  %v717_v49 = vmul.f32 0.2, %v494_v45  ;;  %v980_v50 = vpop.f32.mrf.mxu0  ;;  %v1012_v51 = vpop.f32.mrf.mxu1 }
  0xe7   :  { %v749_v52 = vsel %vm621_vm2, %v366_v44, %v685_v48  ;;  %vm624_vm4 = vcmp.ge.f32.partialorder %v980_v50, 0.0  ;;  %v688_v53 = vmul.f32 0.2, %v980_v50  ;;  %vm656_vm5 = vcmp.ge.f32.partialorder %v1012_v51, 0.0 }
  0xe8   :  { %813 = vst [vmem:[%s1426_s2] sm:$0xff] %v749_v52  ;;  %v781_v54 = vsel %vm653_vm3, %v494_v45, %v717_v49  ;;  %v720_v55 = vmul.f32 0.2, %v1012_v51  ;;  %v369_v56 = vpop.f32.mrf.mxu0  ;;  %v497_v57 = vpop.f32.mrf.mxu1 }
  0xe9   :  { %845 = vst [vmem:[%s1426_s2 + $0x100] sm:$0xff] %v781_v54  ;;  %v752_v58 = vsel %vm624_vm4, %v980_v50, %v688_v53  ;;  %vm622_vm6 = vcmp.ge.f32.partialorder %v369_v56, 0.0  ;;  %v686_v59 = vmul.f32 0.2, %v369_v56  ;;  %vm654_vm7 = vcmp.ge.f32.partialorder %v497_v57, 0.0 }
  0xea   :  { %816 = vst [vmem:[%s1426_s2 + $0x18] sm:$0xff] %v752_v58  ;;  %v784_v60 = vsel %vm656_vm5, %v1012_v51, %v720_v55  ;;  %v718_v61 = vmul.f32 0.2, %v497_v57  ;;  %v983_v62 = vpop.f32.mrf.mxu0  ;;  %v1015_v63 = vpop.f32.mrf.mxu1 }
  0xeb   :  { %848 = vst [vmem:[%s1426_s2 + $0x118] sm:$0xff] %v784_v60  ;;  %v750_v0 = vsel %vm622_vm6, %v369_v56, %v686_v59  ;;  %vm627_vm8 = vcmp.ge.f32.partialorder %v983_v62, 0.0  ;;  %v691_v1 = vmul.f32 0.2, %v983_v62  ;;  %vm659_vm9 = vcmp.ge.f32.partialorder %v1015_v63, 0.0 }
  0xec   :  { %814 = vst [vmem:[%s1426_s2 + $0x8] sm:$0xff] %v750_v0  ;;  %v782_v2 = vsel %vm654_vm7, %v497_v57, %v718_v61  ;;  %v723_v3 = vmul.f32 0.2, %v1015_v63  ;;  %v382_v4 = vpop.f32.mrf.mxu0  ;;  %v510_v5 = vpop.f32.mrf.mxu1 }
  0xed   :  { %846 = vst [vmem:[%s1426_s2 + $0x108] sm:$0xff] %v782_v2  ;;  %v755_v6 = vsel %vm627_vm8, %v983_v62, %v691_v1  ;;  %vm625_vm10 = vcmp.ge.f32.partialorder %v382_v4, 0.0  ;;  %v689_v7 = vmul.f32 0.2, %v382_v4  ;;  %vm657_vm11 = vcmp.ge.f32.partialorder %v510_v5, 0.0 }
  0xee   :  { %819 = vst [vmem:[%s1426_s2 + $0x30] sm:$0xff] %v755_v6  ;;  %v787_v8 = vsel %vm659_vm9, %v1015_v63, %v723_v3  ;;  %v721_v9 = vmul.f32 0.2, %v510_v5  ;;  %v984_v10 = vpop.f32.mrf.mxu0  ;;  %v1016_v11 = vpop.f32.mrf.mxu1 }
  0xef   :  { %851 = vst [vmem:[%s1426_s2 + $0x130] sm:$0xff] %v787_v8  ;;  %v753_v12 = vsel %vm625_vm10, %v382_v4, %v689_v7  ;;  %vm628_vm12 = vcmp.ge.f32.partialorder %v984_v10, 0.0  ;;  %v692_v13 = vmul.f32 0.2, %v984_v10  ;;  %vm660_vm13 = vcmp.ge.f32.partialorder %v1016_v11, 0.0 }
  0xf0   :  { %817 = vst [vmem:[%s1426_s2 + $0x20] sm:$0xff] %v753_v12  ;;  %v785_v14 = vsel %vm657_vm11, %v510_v5, %v721_v9  ;;  %v724_v15 = vmul.f32 0.2, %v1016_v11  ;;  %v385_v16 = vpop.f32.mrf.mxu0  ;;  %v513_v17 = vpop.f32.mrf.mxu1 }
  0xf1   :  { %849 = vst [vmem:[%s1426_s2 + $0x120] sm:$0xff] %v785_v14  ;;  %v756_v18 = vsel %vm628_vm12, %v984_v10, %v692_v13  ;;  %vm626_vm14 = vcmp.ge.f32.partialorder %v385_v16, 0.0  ;;  %v690_v19 = vmul.f32 0.2, %v385_v16  ;;  %vm658_vm15 = vcmp.ge.f32.partialorder %v513_v17, 0.0 }
  0xf2   :  { %820 = vst [vmem:[%s1426_s2 + $0x38] sm:$0xff] %v756_v18  ;;  %v788_v20 = vsel %vm660_vm13, %v1016_v11, %v724_v15  ;;  %v722_v21 = vmul.f32 0.2, %v513_v17  ;;  %v987_v22 = vpop.f32.mrf.mxu0  ;;  %v1019_v23 = vpop.f32.mrf.mxu1 }
  0xf3   :  { %852 = vst [vmem:[%s1426_s2 + $0x138] sm:$0xff] %v788_v20  ;;  %v754_v24 = vsel %vm626_vm14, %v385_v16, %v690_v19  ;;  %vm631_vm0 = vcmp.ge.f32.partialorder %v987_v22, 0.0  ;;  %v695_v25 = vmul.f32 0.2, %v987_v22  ;;  %vm663_vm1 = vcmp.ge.f32.partialorder %v1019_v23, 0.0 }
  0xf4   :  { %818 = vst [vmem:[%s1426_s2 + $0x28] sm:$0xff] %v754_v24  ;;  %v786_v26 = vsel %vm658_vm15, %v513_v17, %v722_v21  ;;  %v727_v27 = vmul.f32 0.2, %v1019_v23  ;;  %v398_v28 = vpop.f32.mrf.mxu0  ;;  %v526_v29 = vpop.f32.mrf.mxu1 }
  0xf5   :  { %850 = vst [vmem:[%s1426_s2 + $0x128] sm:$0xff] %v786_v26  ;;  %v759_v30 = vsel %vm631_vm0, %v987_v22, %v695_v25  ;;  %vm629_vm2 = vcmp.ge.f32.partialorder %v398_v28, 0.0  ;;  %v693_v31 = vmul.f32 0.2, %v398_v28  ;;  %vm661_vm3 = vcmp.ge.f32.partialorder %v526_v29, 0.0 }
  0xf6   :  { %823 = vst [vmem:[%s1426_s2 + $0x50] sm:$0xff] %v759_v30  ;;  %v791_v32 = vsel %vm663_vm1, %v1019_v23, %v727_v27  ;;  %v725_v33 = vmul.f32 0.2, %v526_v29  ;;  %v988_v34 = vpop.f32.mrf.mxu0  ;;  %v1020_v35 = vpop.f32.mrf.mxu1 }
  0xf7   :  { %855 = vst [vmem:[%s1426_s2 + $0x150] sm:$0xff] %v791_v32  ;;  %v757_v36 = vsel %vm629_vm2, %v398_v28, %v693_v31  ;;  %vm632_vm4 = vcmp.ge.f32.partialorder %v988_v34, 0.0  ;;  %v696_v37 = vmul.f32 0.2, %v988_v34  ;;  %vm664_vm5 = vcmp.ge.f32.partialorder %v1020_v35, 0.0 }
  0xf8   :  { %821 = vst [vmem:[%s1426_s2 + $0x40] sm:$0xff] %v757_v36  ;;  %v789_v38 = vsel %vm661_vm3, %v526_v29, %v725_v33  ;;  %v728_v39 = vmul.f32 0.2, %v1020_v35  ;;  %v401_v40 = vpop.f32.mrf.mxu0  ;;  %v529_v41 = vpop.f32.mrf.mxu1 }
  0xf9   :  { %853 = vst [vmem:[%s1426_s2 + $0x140] sm:$0xff] %v789_v38  ;;  %v760_v42 = vsel %vm632_vm4, %v988_v34, %v696_v37  ;;  %vm630_vm6 = vcmp.ge.f32.partialorder %v401_v40, 0.0  ;;  %v694_v43 = vmul.f32 0.2, %v401_v40  ;;  %vm662_vm7 = vcmp.ge.f32.partialorder %v529_v41, 0.0 }
  0xfa   :  { %824 = vst [vmem:[%s1426_s2 + $0x58] sm:$0xff] %v760_v42  ;;  %v792_v44 = vsel %vm664_vm5, %v1020_v35, %v728_v39  ;;  %v726_v45 = vmul.f32 0.2, %v529_v41  ;;  %v991_v46 = vpop.f32.mrf.mxu0  ;;  %v1023_v47 = vpop.f32.mrf.mxu1 }
  0xfb   :  { %856 = vst [vmem:[%s1426_s2 + $0x158] sm:$0xff] %v792_v44  ;;  %v758_v48 = vsel %vm630_vm6, %v401_v40, %v694_v43  ;;  %vm635_vm8 = vcmp.ge.f32.partialorder %v991_v46, 0.0  ;;  %v699_v49 = vmul.f32 0.2, %v991_v46  ;;  %vm667_vm9 = vcmp.ge.f32.partialorder %v1023_v47, 0.0 }
  0xfc   :  { %822 = vst [vmem:[%s1426_s2 + $0x48] sm:$0xff] %v758_v48  ;;  %v790_v50 = vsel %vm662_vm7, %v529_v41, %v726_v45  ;;  %v731_v51 = vmul.f32 0.2, %v1023_v47  ;;  %v414_v52 = vpop.f32.mrf.mxu0  ;;  %v542_v53 = vpop.f32.mrf.mxu1 }
  0xfd   :  { %854 = vst [vmem:[%s1426_s2 + $0x148] sm:$0xff] %v790_v50  ;;  %v763_v54 = vsel %vm635_vm8, %v991_v46, %v699_v49  ;;  %vm633_vm10 = vcmp.ge.f32.partialorder %v414_v52, 0.0  ;;  %v697_v55 = vmul.f32 0.2, %v414_v52  ;;  %vm665_vm11 = vcmp.ge.f32.partialorder %v542_v53, 0.0 }
  0xfe   :  { %827 = vst [vmem:[%s1426_s2 + $0x70] sm:$0xff] %v763_v54  ;;  %v795_v56 = vsel %vm667_vm9, %v1023_v47, %v731_v51  ;;  %v729_v57 = vmul.f32 0.2, %v542_v53  ;;  %v992_v58 = vpop.f32.mrf.mxu0  ;;  %v1024_v59 = vpop.f32.mrf.mxu1 }
  0xff   :  { %859 = vst [vmem:[%s1426_s2 + $0x170] sm:$0xff] %v795_v56  ;;  %v761_v60 = vsel %vm633_vm10, %v414_v52, %v697_v55  ;;  %vm636_vm12 = vcmp.ge.f32.partialorder %v992_v58, 0.0  ;;  %v700_v61 = vmul.f32 0.2, %v992_v58  ;;  %vm668_vm13 = vcmp.ge.f32.partialorder %v1024_v59, 0.0 }
 0x100   :  { %825 = vst [vmem:[%s1426_s2 + $0x60] sm:$0xff] %v761_v60  ;;  %v793_v62 = vsel %vm665_vm11, %v542_v53, %v729_v57  ;;  %v732_v63 = vmul.f32 0.2, %v1024_v59  ;;  %v417_v0 = vpop.f32.mrf.mxu0  ;;  %v545_v1 = vpop.f32.mrf.mxu1 }
 0x101   :  { %857 = vst [vmem:[%s1426_s2 + $0x160] sm:$0xff] %v793_v62  ;;  %v764_v2 = vsel %vm636_vm12, %v992_v58, %v700_v61  ;;  %vm634_vm14 = vcmp.ge.f32.partialorder %v417_v0, 0.0  ;;  %v698_v3 = vmul.f32 0.2, %v417_v0  ;;  %vm666_vm15 = vcmp.ge.f32.partialorder %v545_v1, 0.0 }
 0x102   :  { %828 = vst [vmem:[%s1426_s2 + $0x78] sm:$0xff] %v764_v2  ;;  %v796_v4 = vsel %vm668_vm13, %v1024_v59, %v732_v63  ;;  %v730_v5 = vmul.f32 0.2, %v545_v1  ;;  %v995_v6 = vpop.f32.mrf.mxu0  ;;  %v1027_v7 = vpop.f32.mrf.mxu1 }
 0x103   :  { %860 = vst [vmem:[%s1426_s2 + $0x178] sm:$0xff] %v796_v4  ;;  %v762_v8 = vsel %vm634_vm14, %v417_v0, %v698_v3  ;;  %vm639_vm0 = vcmp.ge.f32.partialorder %v995_v6, 0.0  ;;  %v703_v9 = vmul.f32 0.2, %v995_v6  ;;  %vm671_vm1 = vcmp.ge.f32.partialorder %v1027_v7, 0.0 }
 0x104   :  { %826 = vst [vmem:[%s1426_s2 + $0x68] sm:$0xff] %v762_v8  ;;  %v794_v10 = vsel %vm666_vm15, %v545_v1, %v730_v5  ;;  %v735_v11 = vmul.f32 0.2, %v1027_v7  ;;  %v430_v12 = vpop.f32.mrf.mxu0  ;;  %v558_v13 = vpop.f32.mrf.mxu1 }
 0x105   :  { %858 = vst [vmem:[%s1426_s2 + $0x168] sm:$0xff] %v794_v10  ;;  %v767_v14 = vsel %vm639_vm0, %v995_v6, %v703_v9  ;;  %vm637_vm2 = vcmp.ge.f32.partialorder %v430_v12, 0.0  ;;  %v701_v15 = vmul.f32 0.2, %v430_v12  ;;  %vm669_vm3 = vcmp.ge.f32.partialorder %v558_v13, 0.0 }
 0x106   :  { %831 = vst [vmem:[%s1426_s2 + $0x90] sm:$0xff] %v767_v14  ;;  %v799_v16 = vsel %vm671_vm1, %v1027_v7, %v735_v11  ;;  %v733_v17 = vmul.f32 0.2, %v558_v13  ;;  %v996_v18 = vpop.f32.mrf.mxu0  ;;  %v1028_v19 = vpop.f32.mrf.mxu1 }
 0x107   :  { %863 = vst [vmem:[%s1426_s2 + $0x190] sm:$0xff] %v799_v16  ;;  %v765_v20 = vsel %vm637_vm2, %v430_v12, %v701_v15  ;;  %vm640_vm4 = vcmp.ge.f32.partialorder %v996_v18, 0.0  ;;  %v704_v21 = vmul.f32 0.2, %v996_v18  ;;  %vm672_vm5 = vcmp.ge.f32.partialorder %v1028_v19, 0.0 }
 0x108   :  { %829 = vst [vmem:[%s1426_s2 + $0x80] sm:$0xff] %v765_v20  ;;  %v797_v22 = vsel %vm669_vm3, %v558_v13, %v733_v17  ;;  %v736_v23 = vmul.f32 0.2, %v1028_v19  ;;  %v433_v24 = vpop.f32.mrf.mxu0  ;;  %v561_v25 = vpop.f32.mrf.mxu1 }
 0x109   :  { %861 = vst [vmem:[%s1426_s2 + $0x180] sm:$0xff] %v797_v22  ;;  %v768_v26 = vsel %vm640_vm4, %v996_v18, %v704_v21  ;;  %vm638_vm6 = vcmp.ge.f32.partialorder %v433_v24, 0.0  ;;  %v702_v27 = vmul.f32 0.2, %v433_v24  ;;  %vm670_vm7 = vcmp.ge.f32.partialorder %v561_v25, 0.0 }
 0x10a   :  { %832 = vst [vmem:[%s1426_s2 + $0x98] sm:$0xff] %v768_v26  ;;  %v800_v28 = vsel %vm672_vm5, %v1028_v19, %v736_v23  ;;  %v734_v29 = vmul.f32 0.2, %v561_v25  ;;  %v999_v30 = vpop.f32.mrf.mxu0  ;;  %v1031_v31 = vpop.f32.mrf.mxu1 }
 0x10b   :  { %864 = vst [vmem:[%s1426_s2 + $0x198] sm:$0xff] %v800_v28  ;;  %v766_v32 = vsel %vm638_vm6, %v433_v24, %v702_v27  ;;  %vm643_vm8 = vcmp.ge.f32.partialorder %v999_v30, 0.0  ;;  %v707_v33 = vmul.f32 0.2, %v999_v30  ;;  %vm675_vm9 = vcmp.ge.f32.partialorder %v1031_v31, 0.0 }
 0x10c   :  { %830 = vst [vmem:[%s1426_s2 + $0x88] sm:$0xff] %v766_v32  ;;  %v798_v34 = vsel %vm670_vm7, %v561_v25, %v734_v29  ;;  %v739_v35 = vmul.f32 0.2, %v1031_v31  ;;  %v446_v36 = vpop.f32.mrf.mxu0  ;;  %v574_v37 = vpop.f32.mrf.mxu1 }
 0x10d   :  { %862 = vst [vmem:[%s1426_s2 + $0x188] sm:$0xff] %v798_v34  ;;  %v771_v38 = vsel %vm643_vm8, %v999_v30, %v707_v33  ;;  %vm641_vm10 = vcmp.ge.f32.partialorder %v446_v36, 0.0  ;;  %v705_v39 = vmul.f32 0.2, %v446_v36  ;;  %vm673_vm11 = vcmp.ge.f32.partialorder %v574_v37, 0.0 }
 0x10e   :  { %835 = vst [vmem:[%s1426_s2 + $0xb0] sm:$0xff] %v771_v38  ;;  %v803_v40 = vsel %vm675_vm9, %v1031_v31, %v739_v35  ;;  %v737_v41 = vmul.f32 0.2, %v574_v37  ;;  %v1000_v42 = vpop.f32.mrf.mxu0  ;;  %v1032_v43 = vpop.f32.mrf.mxu1 }
 0x10f   :  { %867 = vst [vmem:[%s1426_s2 + $0x1b0] sm:$0xff] %v803_v40  ;;  %v769_v44 = vsel %vm641_vm10, %v446_v36, %v705_v39  ;;  %vm644_vm12 = vcmp.ge.f32.partialorder %v1000_v42, 0.0  ;;  %v708_v45 = vmul.f32 0.2, %v1000_v42  ;;  %vm676_vm13 = vcmp.ge.f32.partialorder %v1032_v43, 0.0 }
 0x110   :  { %833 = vst [vmem:[%s1426_s2 + $0xa0] sm:$0xff] %v769_v44  ;;  %v801_v46 = vsel %vm673_vm11, %v574_v37, %v737_v41  ;;  %v740_v47 = vmul.f32 0.2, %v1032_v43  ;;  %v449_v48 = vpop.f32.mrf.mxu0  ;;  %v577_v49 = vpop.f32.mrf.mxu1 }
 0x111   :  { %865 = vst [vmem:[%s1426_s2 + $0x1a0] sm:$0xff] %v801_v46  ;;  %v772_v50 = vsel %vm644_vm12, %v1000_v42, %v708_v45  ;;  %vm642_vm14 = vcmp.ge.f32.partialorder %v449_v48, 0.0  ;;  %v706_v51 = vmul.f32 0.2, %v449_v48  ;;  %vm674_vm15 = vcmp.ge.f32.partialorder %v577_v49, 0.0 }
 0x112   :  { %836 = vst [vmem:[%s1426_s2 + $0xb8] sm:$0xff] %v772_v50  ;;  %v804_v52 = vsel %vm676_vm13, %v1032_v43, %v740_v47  ;;  %v738_v53 = vmul.f32 0.2, %v577_v49  ;;  %v1003_v54 = vpop.f32.mrf.mxu0  ;;  %v1035_v55 = vpop.f32.mrf.mxu1 }
 0x113   :  { %868 = vst [vmem:[%s1426_s2 + $0x1b8] sm:$0xff] %v804_v52  ;;  %v770_v56 = vsel %vm642_vm14, %v449_v48, %v706_v51  ;;  %vm647_vm0 = vcmp.ge.f32.partialorder %v1003_v54, 0.0  ;;  %v711_v57 = vmul.f32 0.2, %v1003_v54  ;;  %vm679_vm1 = vcmp.ge.f32.partialorder %v1035_v55, 0.0 }
 0x114   :  { %834 = vst [vmem:[%s1426_s2 + $0xa8] sm:$0xff] %v770_v56  ;;  %v802_v58 = vsel %vm674_vm15, %v577_v49, %v738_v53  ;;  %v743_v59 = vmul.f32 0.2, %v1035_v55  ;;  %v462_v60 = vpop.f32.mrf.mxu0  ;;  %v590_v61 = vpop.f32.mrf.mxu1 }
 0x115   :  { %866 = vst [vmem:[%s1426_s2 + $0x1a8] sm:$0xff] %v802_v58  ;;  %v775_v62 = vsel %vm647_vm0, %v1003_v54, %v711_v57  ;;  %vm645_vm2 = vcmp.ge.f32.partialorder %v462_v60, 0.0  ;;  %v709_v63 = vmul.f32 0.2, %v462_v60  ;;  %vm677_vm3 = vcmp.ge.f32.partialorder %v590_v61, 0.0 }
 0x116   :  { %839 = vst [vmem:[%s1426_s2 + $0xd0] sm:$0xff] %v775_v62  ;;  %v807_v0 = vsel %vm679_vm1, %v1035_v55, %v743_v59  ;;  %v741_v1 = vmul.f32 0.2, %v590_v61  ;;  %v1004_v2 = vpop.f32.mrf.mxu0  ;;  %v1036_v3 = vpop.f32.mrf.mxu1 }
 0x117   :  { %871 = vst [vmem:[%s1426_s2 + $0x1d0] sm:$0xff] %v807_v0  ;;  %v773_v4 = vsel %vm645_vm2, %v462_v60, %v709_v63  ;;  %vm648_vm4 = vcmp.ge.f32.partialorder %v1004_v2, 0.0  ;;  %v712_v5 = vmul.f32 0.2, %v1004_v2  ;;  %vm680_vm5 = vcmp.ge.f32.partialorder %v1036_v3, 0.0 }
 0x118   :  { %837 = vst [vmem:[%s1426_s2 + $0xc0] sm:$0xff] %v773_v4  ;;  %v805_v6 = vsel %vm677_vm3, %v590_v61, %v741_v1  ;;  %v744_v7 = vmul.f32 0.2, %v1036_v3  ;;  %v465_v8 = vpop.f32.mrf.mxu0  ;;  %v593_v9 = vpop.f32.mrf.mxu1 }
 0x119   :  { %869 = vst [vmem:[%s1426_s2 + $0x1c0] sm:$0xff] %v805_v6  ;;  %v776_v10 = vsel %vm648_vm4, %v1004_v2, %v712_v5  ;;  %vm646_vm6 = vcmp.ge.f32.partialorder %v465_v8, 0.0  ;;  %v710_v11 = vmul.f32 0.2, %v465_v8  ;;  %vm678_vm7 = vcmp.ge.f32.partialorder %v593_v9, 0.0 }
 0x11a   :  { %840 = vst [vmem:[%s1426_s2 + $0xd8] sm:$0xff] %v776_v10  ;;  %v808_v12 = vsel %vm680_vm5, %v1036_v3, %v744_v7  ;;  %v742_v13 = vmul.f32 0.2, %v593_v9  ;;  %v1007_v14 = vpop.f32.mrf.mxu0  ;;  %v1039_v15 = vpop.f32.mrf.mxu1 }
 0x11b   :  { %872 = vst [vmem:[%s1426_s2 + $0x1d8] sm:$0xff] %v808_v12  ;;  %v774_v16 = vsel %vm646_vm6, %v465_v8, %v710_v11  ;;  %vm651_vm8 = vcmp.ge.f32.partialorder %v1007_v14, 0.0  ;;  %v715_v17 = vmul.f32 0.2, %v1007_v14  ;;  %vm683_vm9 = vcmp.ge.f32.partialorder %v1039_v15, 0.0 }
 0x11c   :  { %838 = vst [vmem:[%s1426_s2 + $0xc8] sm:$0xff] %v774_v16  ;;  %v806_v18 = vsel %vm678_vm7, %v593_v9, %v742_v13  ;;  %v747_v19 = vmul.f32 0.2, %v1039_v15  ;;  %v478_v20 = vpop.f32.mrf.mxu0  ;;  %v606_v21 = vpop.f32.mrf.mxu1 }
 0x11d   :  { %870 = vst [vmem:[%s1426_s2 + $0x1c8] sm:$0xff] %v806_v18  ;;  %v779_v22 = vsel %vm651_vm8, %v1007_v14, %v715_v17  ;;  %vm649_vm10 = vcmp.ge.f32.partialorder %v478_v20, 0.0  ;;  %v713_v23 = vmul.f32 0.2, %v478_v20  ;;  %vm681_vm11 = vcmp.ge.f32.partialorder %v606_v21, 0.0 }
 0x11e   :  { %843 = vst [vmem:[%s1426_s2 + $0xf0] sm:$0xff] %v779_v22  ;;  %v811_v24 = vsel %vm683_vm9, %v1039_v15, %v747_v19  ;;  %v745_v25 = vmul.f32 0.2, %v606_v21  ;;  %v1008_v26 = vpop.f32.mrf.mxu0  ;;  %v1040_v27 = vpop.f32.mrf.mxu1 }
 0x11f   :  { %875 = vst [vmem:[%s1426_s2 + $0x1f0] sm:$0xff] %v811_v24  ;;  %v777_v28 = vsel %vm649_vm10, %v478_v20, %v713_v23  ;;  %vm652_vm12 = vcmp.ge.f32.partialorder %v1008_v26, 0.0  ;;  %v716_v29 = vmul.f32 0.2, %v1008_v26  ;;  %vm684_vm13 = vcmp.ge.f32.partialorder %v1040_v27, 0.0 }
 0x120   :  { %841 = vst [vmem:[%s1426_s2 + $0xe0] sm:$0xff] %v777_v28  ;;  %v809_v30 = vsel %vm681_vm11, %v606_v21, %v745_v25  ;;  %v748_v31 = vmul.f32 0.2, %v1040_v27  ;;  %v481_v32 = vpop.f32.mrf.mxu0  ;;  %v609_v33 = vpop.f32.mrf.mxu1 }
 0x121   :  { %873 = vst [vmem:[%s1426_s2 + $0x1e0] sm:$0xff] %v809_v30  ;;  %v780_v34 = vsel %vm652_vm12, %v1008_v26, %v716_v29  ;;  %vm650_vm14 = vcmp.ge.f32.partialorder %v481_v32, 0.0  ;;  %v714_v35 = vmul.f32 0.2, %v481_v32  ;;  %vm682_vm15 = vcmp.ge.f32.partialorder %v609_v33, 0.0 }
 0x122   :  { %844 = vst [vmem:[%s1426_s2 + $0xf8] sm:$0xff] %v780_v34  ;;  %v812_v36 = vsel %vm684_vm13, %v1040_v27, %v748_v31  ;;  %v746_v37 = vmul.f32 0.2, %v609_v33 }
 0x123   :  { %876 = vst [vmem:[%s1426_s2 + $0x1f8] sm:$0xff] %v812_v36  ;;  %v778_v38 = vsel %vm650_vm14, %v481_v32, %v714_v35 }
 0x124   :  { %842 = vst [vmem:[%s1426_s2 + $0xe8] sm:$0xff] %v778_v38  ;;  %v810_v39 = vsel %vm682_vm15, %v609_v33, %v746_v37 }
 0x125   :  { %874 = vst [vmem:[%s1426_s2 + $0x1e8] sm:$0xff] %v810_v39 }

// kernel: _lambda_.7
= control target key start
LH: loop header
LB: loop body
LE: loop exit
PB: predicated region body
PF: predicated region fallthrough
CT: control target
= control target key end

     0   :  { %s551_s1 = inlined_call_operand.vmem [shape: bf16[128,128], index: 1, kind: input, shape index: {}]   ;;  %s552_s0 = inlined_call_operand.vmem [shape: bf16[128,128], index: 0, kind: input, shape index: {}]   ;;  %s553_s2 = inlined_call_operand.vmem [shape: f32[128,128], index: 2, kind: output, shape index: {0}]   ;;  %s554_s3 = inlined_call_operand.vmem [shape: f32[1,8,128], index: 3, kind: output, shape index: {1}]   ;;  %s555_s4 = inlined_call_operand.vmem [shape: f32[1,8,128], index: 4, kind: output, shape index: {2}]  }
   0x1   :  { %v408_v0 = vld [vmem:[%s551_s1 + $0x38] sm:$0xff]   ;;  %v409_v1 = vld [vmem:[%s551_s1 + $0x30] sm:$0xff]   ;;  %v410_v2 = vld [vmem:[%s551_s1 + $0x28] sm:$0xff]  }
   0x2   :  { %360 = vmatprep.subr.bf16.mxu0 %v408_v0  ;;  %392 = vmatprep.subr.bf16.mxu1 %v408_v0  ;;  %v411_v3 = vld [vmem:[%s551_s1 + $0x20] sm:$0xff]   ;;  %v412_v5 = vld [vmem:[%s551_s1 + $0x18] sm:$0xff]   ;;  %v413_v7 = vld [vmem:[%s551_s1 + $0x10] sm:$0xff]  }
   0x3   :  { %361 = vmatpush3.bf16.msra.mxu0 %v408_v0  ;;  %400 = vmatpush3.bf16.msra.mxu1 %v408_v0  ;;  %v416_v4 = vld [vmem:[%s552_s0] sm:$0xff]   ;;  %v414_v8 = vld [vmem:[%s551_s1 + $0x8] sm:$0xff]   ;;  %v418_v12 = vld [vmem:[%s552_s0 + $0x10] sm:$0xff]  }
   0x4   :  { %362 = vmatprep.subr.bf16.mxu0 %v409_v1  ;;  %393 = vmatprep.subr.bf16.mxu1 %v409_v1  ;;  %v420_v6 = vld [vmem:[%s552_s0 + $0x20] sm:$0xff]   ;;  %v417_v10 = vld [vmem:[%s552_s0 + $0x8] sm:$0xff]   ;;  %v422_v13 = vld [vmem:[%s552_s0 + $0x30] sm:$0xff]  }
   0x5   :  { %376 = vmatprep.mubr.bf16.mxu0 %v416_v4  ;;  %384 = vmatprep.mubr.bf16.mxu1 %v420_v6  ;;  %v415_v9 = vld [vmem:[%s551_s1] sm:$0xff]   ;;  %v421_v11 = vld [vmem:[%s552_s0 + $0x28] sm:$0xff]   ;;  %v419_v14 = vld [vmem:[%s552_s0 + $0x18] sm:$0xff]  }
   0x6   :  { %v423_v15 = vld [vmem:[%s552_s0 + $0x38] sm:$0xff]  }
   0x7   :  { %363 = vmatpush3.bf16.msra.mxu0 %v409_v1  ;;  %401 = vmatpush3.bf16.msra.mxu1 %v409_v1 }
   0x8   :  { %364 = vmatprep.subr.bf16.mxu0 %v410_v2  ;;  %394 = vmatprep.subr.bf16.mxu1 %v410_v2 }
   0xb   :  { %365 = vmatpush3.bf16.msra.mxu0 %v410_v2  ;;  %402 = vmatpush3.bf16.msra.mxu1 %v410_v2 }
   0xc   :  { %366 = vmatprep.subr.bf16.mxu0 %v411_v3  ;;  %395 = vmatprep.subr.bf16.mxu1 %v411_v3 }
   0xf   :  { %367 = vmatpush3.bf16.msra.mxu0 %v411_v3  ;;  %403 = vmatpush3.bf16.msra.mxu1 %v411_v3 }
  0x10   :  { %368 = vmatprep.subr.bf16.mxu0 %v412_v5  ;;  %396 = vmatprep.subr.bf16.mxu1 %v412_v5 }
  0x13   :  { %369 = vmatpush3.bf16.msra.mxu0 %v412_v5  ;;  %404 = vmatpush3.bf16.msra.mxu1 %v412_v5 }
  0x14   :  { %370 = vmatprep.subr.bf16.mxu0 %v413_v7  ;;  %397 = vmatprep.subr.bf16.mxu1 %v413_v7 }
  0x17   :  { %371 = vmatpush3.bf16.msra.mxu0 %v413_v7  ;;  %405 = vmatpush3.bf16.msra.mxu1 %v413_v7 }
  0x18   :  { %372 = vmatprep.subr.bf16.mxu0 %v414_v8  ;;  %398 = vmatprep.subr.bf16.mxu1 %v414_v8 }
  0x1b   :  { %373 = vmatpush3.bf16.msra.mxu0 %v414_v8  ;;  %406 = vmatpush3.bf16.msra.mxu1 %v414_v8 }
  0x1c   :  { %374 = vmatprep.subr.bf16.mxu0 %v415_v9  ;;  %399 = vmatprep.subr.bf16.mxu1 %v415_v9 }
  0x1f   :  { %375 = vmatpush3.bf16.msra.mxu0 %v415_v9  ;;  %407 = vmatpush3.bf16.msra.mxu1 %v415_v9 }
  0x22   :  { %377 = vmatmul.mubr.bf16.vlgmr.msra.gmra.mxu0 %v417_v10  ;;  %385 = vmatmul.mubr.bf16.vlgmr.msra.gmra.mxu1 %v421_v11 }
  0x23   :  { %380 = vmatprep.mubr.bf16.mxu0 %v418_v12  ;;  %388 = vmatprep.mubr.bf16.mxu1 %v422_v13 }
  0x2a   :  { %381 = vmatmul.mubr.bf16.gmra.mxu0 %v419_v14  ;;  %389 = vmatmul.mubr.bf16.gmra.mxu1 %v423_v15 }
  0xe2   :  { %v378_v16 = vpop.f32.mrf.mxu0  ;;  %v386_v17 = vpop.f32.mrf.mxu1 }
  0xe3   :  { %242 = vst [vmem:[%s553_s2 + $0x10] sm:$0xff] %v378_v16  ;;  %250 = vst [vmem:[%s553_s2 + $0x50] sm:$0xff] %v386_v17  ;;  %v280_v29 = vmul.f32 %v378_v16, %v378_v16  ;;  %v288_v59 = vmul.f32 %v386_v17, %v386_v17 }
  0xe4   :  { %v177_v18 = vpop.f32.mrf.mxu0  ;;  %v209_v19 = vpop.f32.mrf.mxu1 }
  0xe5   :  { %240 = vst [vmem:[%s553_s2] sm:$0xff] %v177_v18  ;;  %248 = vst [vmem:[%s553_s2 + $0x40] sm:$0xff] %v209_v19  ;;  %v278_v24 = vmul.f32 %v177_v18, %v177_v18  ;;  %v286_v53 = vmul.f32 %v209_v19, %v209_v19 }
  0xe6   :  { %v379_v20 = vpop.f32.mrf.mxu0  ;;  %v387_v21 = vpop.f32.mrf.mxu1 }
  0xe7   :  { %243 = vst [vmem:[%s553_s2 + $0x18] sm:$0xff] %v379_v20  ;;  %251 = vst [vmem:[%s553_s2 + $0x58] sm:$0xff] %v387_v21  ;;  %v281_v34 = vmul.f32 %v379_v20, %v379_v20  ;;  %v289_v62 = vmul.f32 %v387_v21, %v387_v21 }
  0xe8   :  { %v180_v22 = vpop.f32.mrf.mxu0  ;;  %v212_v23 = vpop.f32.mrf.mxu1 }
  0xe9   :  { %241 = vst [vmem:[%s553_s2 + $0x8] sm:$0xff] %v180_v22  ;;  %v256_v25 = vadd.f32 %v180_v22, %v177_v18  ;;  %v279_v26 = vmul.f32 %v180_v22, %v180_v22  ;;  %249 = vst [vmem:[%s553_s2 + $0x48] sm:$0xff] %v212_v23  ;;  %v287_v57 = vmul.f32 %v212_v23, %v212_v23 }
  0xea   :  { %v382_v27 = vpop.f32.mrf.mxu0  ;;  %v390_v28 = vpop.f32.mrf.mxu1 }
  0xeb   :  { %v257_v30 = vadd.f32 %v378_v16, %v256_v25  ;;  %v294_v31 = vadd.f32 %v279_v26, %v278_v24  ;;  %246 = vst [vmem:[%s553_s2 + $0x30] sm:$0xff] %v382_v27  ;;  %254 = vst [vmem:[%s553_s2 + $0x70] sm:$0xff] %v390_v28  ;;  %v284_v47 = vmul.f32 %v382_v27, %v382_v27 }
  0xec   :  { %v193_v32 = vpop.f32.mrf.mxu0  ;;  %v225_v33 = vpop.f32.mrf.mxu1  ;;  %v292_v7 = vmul.f32 %v390_v28, %v390_v28 }
  0xed   :  { %v295_v35 = vadd.f32 %v294_v31, %v280_v29  ;;  %244 = vst [vmem:[%s553_s2 + $0x20] sm:$0xff] %v193_v32  ;;  %v258_v36 = vadd.f32 %v379_v20, %v257_v30  ;;  %252 = vst [vmem:[%s553_s2 + $0x60] sm:$0xff] %v225_v33  ;;  %v282_v40 = vmul.f32 %v193_v32, %v193_v32 }
  0xee   :  { %v383_v37 = vpop.f32.mrf.mxu0  ;;  %v391_v38 = vpop.f32.mrf.mxu1  ;;  %v290_v2 = vmul.f32 %v225_v33, %v225_v33 }
  0xef   :  { %v259_v39 = vadd.f32 %v258_v36, %v193_v32  ;;  %v296_v41 = vadd.f32 %v295_v35, %v281_v34  ;;  %247 = vst [vmem:[%s553_s2 + $0x38] sm:$0xff] %v383_v37  ;;  %255 = vst [vmem:[%s553_s2 + $0x78] sm:$0xff] %v391_v38  ;;  %v285_v50 = vmul.f32 %v383_v37, %v383_v37 }
  0xf0   :  { %v196_v42 = vpop.f32.mrf.mxu0  ;;  %v228_v43 = vpop.f32.mrf.mxu1  ;;  %v293_v10 = vmul.f32 %v391_v38, %v391_v38 }
  0xf1   :  { %v297_v44 = vadd.f32 %v296_v41, %v282_v40  ;;  %245 = vst [vmem:[%s553_s2 + $0x28] sm:$0xff] %v196_v42  ;;  %v260_v45 = vadd.f32 %v259_v39, %v196_v42  ;;  %v283_v46 = vmul.f32 %v196_v42, %v196_v42  ;;  %253 = vst [vmem:[%s553_s2 + $0x68] sm:$0xff] %v228_v43 }
  0xf2   :  { %v291_v6 = vmul.f32 %v228_v43, %v228_v43 }
  0xf3   :  { %v261_v48 = vadd.f32 %v382_v27, %v260_v45  ;;  %v298_v49 = vadd.f32 %v297_v44, %v283_v46 }
  0xf5   :  { %v262_v51 = vadd.f32 %v383_v37, %v261_v48  ;;  %v299_v52 = vadd.f32 %v298_v49, %v284_v47 }
  0xf7   :  { %v300_v54 = vadd.f32 %v299_v52, %v285_v50  ;;  %v263_v55 = vadd.f32 %v262_v51, %v209_v19 }
  0xf9   :  { %v264_v56 = vadd.f32 %v263_v55, %v212_v23  ;;  %v301_v58 = vadd.f32 %v300_v54, %v286_v53 }
  0xfb   :  { %v265_v60 = vadd.f32 %v386_v17, %v264_v56  ;;  %v302_v61 = vadd.f32 %v301_v58, %v287_v57 }
  0xfd   :  { %v303_v63 = vadd.f32 %v302_v61, %v288_v59  ;;  %v266_v0 = vadd.f32 %v387_v21, %v265_v60 }
  0xff   :  { %v267_v1 = vadd.f32 %v266_v0, %v225_v33  ;;  %v304_v3 = vadd.f32 %v303_v63, %v289_v62 }
 0x101   :  { %v305_v4 = vadd.f32 %v304_v3, %v290_v2  ;;  %v268_v5 = vadd.f32 %v267_v1, %v228_v43 }
 0x103   :  { %v269_v8 = vadd.f32 %v390_v28, %v268_v5  ;;  %v306_v9 = vadd.f32 %v305_v4, %v291_v6 }
 0x105   :  { %v270_v11 = vadd.f32 %v391_v38, %v269_v8  ;;  %v307_v12 = vadd.f32 %v306_v9, %v292_v7 }
 0x107   :  { %v271_v13 = vrot.slane %v270_v11, 4  ;;  %v308_v14 = vadd.f32 %v307_v12, %v293_v10 }
 0x109   :  { %v272_v15 = vadd.f32 %v271_v13, %v270_v11  ;;  %v309_v16 = vrot.slane %v308_v14, 4 }
 0x10b   :  { %v273_v17 = vrot.slane %v272_v15, 2  ;;  %v310_v18 = vadd.f32 %v309_v16, %v308_v14 }
 0x10d   :  { %v274_v19 = vadd.f32 %v273_v17, %v272_v15  ;;  %v311_v20 = vrot.slane %v310_v18, 2 }
 0x10f   :  { %v275_v21 = vrot.slane %v274_v19, 1  ;;  %v312_v22 = vadd.f32 %v311_v20, %v310_v18 }
 0x111   :  { %v276_v23 = vadd.f32 %v275_v21, %v274_v19  ;;  %v313_v24 = vrot.slane %v312_v22, 1 }
 0x113   :  { %277 = vst [vmem:[%s554_s3] sm:$0xff] %v276_v23  ;;  %v314_v25 = vadd.f32 %v313_v24, %v312_v22 }
 0x115   :  { %315 = vst [vmem:[%s555_s4] sm:$0xff] %v314_v25 }

// kernel: _lambda_.8
= control target key start
LH: loop header
LB: loop body
LE: loop exit
PB: predicated region body
PF: predicated region fallthrough
CT: control target
= control target key end

     0   :  { %s305_s0 = inlined_call_operand.vmem [shape: f32[128,128], index: 0, kind: input, shape index: {}]   ;;  %s306_s1 = inlined_call_operand.vmem [shape: f32[1,128], index: 1, kind: input, shape index: {}]   ;;  %s307_s2 = inlined_call_operand.vmem [shape: f32[1,128], index: 2, kind: input, shape index: {}]   ;;  %s308_s3 = inlined_call_operand.vmem [shape: f32[128,128], index: 3, kind: output, shape index: {}]  }
   0x1   :  { %v14_v0 = vld [vmem:[%s305_s0] sm:$0xff]  ;;  %v15_v4 = vld [vmem:[%s305_s0 + $0x8] sm:$0xff]  ;;  %v16_v5 = vld [vmem:[%s305_s0 + $0x10] sm:$0xff] }
   0x2   :  { %v172_v1 = vld [vmem:[%s306_s1] ss:$0 sm:$0xff]  ;;  %v17_v6 = vld [vmem:[%s305_s0 + $0x18] sm:$0xff]  ;;  %v19_v11 = vld [vmem:[%s305_s0 + $0x28] sm:$0xff] }
   0x3   :  { %v177_v2 = vld [vmem:[%s307_s2] ss:$0 sm:$0xff]  ;;  %v37_v3 = vmul.f32 %v172_v1, %v14_v0  ;;  %v38_v7 = vmul.f32 %v172_v1, %v15_v4  ;;  %v39_v8 = vmul.f32 %v172_v1, %v16_v5  ;;  %v40_v9 = vmul.f32 %v172_v1, %v17_v6  ;;  %v20_v12 = vld [vmem:[%s305_s0 + $0x30] sm:$0xff]  ;;  %v21_v17 = vld [vmem:[%s305_s0 + $0x38] sm:$0xff] }
   0x4   :  { %v18_v10 = vld [vmem:[%s305_s0 + $0x20] sm:$0xff]  ;;  %v42_v15 = vmul.f32 %v172_v1, %v19_v11  ;;  %v43_v16 = vmul.f32 %v172_v1, %v20_v12  ;;  %v44_v21 = vmul.f32 %v172_v1, %v21_v17  ;;  %v23_v30 = vld [vmem:[%s305_s0 + $0x48] sm:$0xff]  ;;  %v24_v31 = vld [vmem:[%s305_s0 + $0x50] sm:$0xff] }
   0x5   :  { %v60_v13 = vadd.f32 %v177_v2, %v37_v3  ;;  %v41_v14 = vmul.f32 %v172_v1, %v18_v10  ;;  %v61_v18 = vadd.f32 %v177_v2, %v38_v7  ;;  %v62_v19 = vadd.f32 %v177_v2, %v39_v8  ;;  %v22_v25 = vld [vmem:[%s305_s0 + $0x40] sm:$0xff]  ;;  %v25_v43 = vld [vmem:[%s305_s0 + $0x58] sm:$0xff]  ;;  %v27_v45 = vld [vmem:[%s305_s0 + $0x68] sm:$0xff] }
   0x6   :  { %v63_v20 = vadd.f32 %v177_v2, %v40_v9  ;;  %v65_v24 = vadd.f32 %v177_v2, %v42_v15  ;;  %v66_v37 = vadd.f32 %v177_v2, %v43_v16  ;;  %v67_v38 = vadd.f32 %v177_v2, %v44_v21  ;;  %v26_v44 = vld [vmem:[%s305_s0 + $0x60] sm:$0xff]  ;;  %v28_v56 = vld [vmem:[%s305_s0 + $0x70] sm:$0xff]  ;;  %v29_v4 = vld [vmem:[%s305_s0 + $0x78] sm:$0xff] }
   0x7   :  { %vm76_vm0 = vcmp.ge.f32.partialorder %v60_v13, 0.0  ;;  %v92_v22 = vmul.f32 0.2, %v60_v13  ;;  %v64_v23 = vadd.f32 %v177_v2, %v41_v14  ;;  %vm77_vm1 = vcmp.ge.f32.partialorder %v61_v18, 0.0 }
   0x8   :  { %v93_v26 = vmul.f32 0.2, %v61_v18  ;;  %vm78_vm2 = vcmp.ge.f32.partialorder %v62_v19, 0.0  ;;  %v94_v27 = vmul.f32 0.2, %v62_v19  ;;  %vm79_vm3 = vcmp.ge.f32.partialorder %v63_v20, 0.0 }
   0x9   :  { %v108_v28 = vsel %vm76_vm0, %v60_v13, %v92_v22  ;;  %v95_v29 = vmul.f32 0.2, %v63_v20  ;;  %vm80_vm4 = vcmp.ge.f32.partialorder %v64_v23, 0.0  ;;  %v96_v34 = vmul.f32 0.2, %v64_v23 }
   0xa   :  { %124 = vst [vmem:[%s308_s3] sm:$0xff] %v108_v28  ;;  %v109_v32 = vsel %vm77_vm1, %v61_v18, %v93_v26  ;;  %v110_v33 = vsel %vm78_vm2, %v62_v19, %v94_v27  ;;  %vm81_vm5 = vcmp.ge.f32.partialorder %v65_v24, 0.0  ;;  %v97_v36 = vmul.f32 0.2, %v65_v24 }
   0xb   :  { %125 = vst [vmem:[%s308_s3 + $0x8] sm:$0xff] %v109_v32  ;;  %126 = vst [vmem:[%s308_s3 + $0x10] sm:$0xff] %v110_v33  ;;  %v111_v35 = vsel %vm79_vm3, %v63_v20, %v95_v29  ;;  %v112_v39 = vsel %vm80_vm4, %v64_v23, %v96_v34  ;;  %v45_v40 = vmul.f32 %v172_v1, %v22_v25  ;;  %vm82_vm6 = vcmp.ge.f32.partialorder %v66_v37, 0.0 }
   0xc   :  { %127 = vst [vmem:[%s308_s3 + $0x18] sm:$0xff] %v111_v35  ;;  %v46_v41 = vmul.f32 %v172_v1, %v23_v30  ;;  %v47_v42 = vmul.f32 %v172_v1, %v24_v31  ;;  %128 = vst [vmem:[%s308_s3 + $0x20] sm:$0xff] %v112_v39  ;;  %v113_v46 = vsel %vm81_vm5, %v65_v24, %v97_v36  ;;  %v98_v47 = vmul.f32 0.2, %v66_v37 }
   0xd   :  { %vm83_vm7 = vcmp.ge.f32.partialorder %v67_v38, 0.0  ;;  %129 = vst [vmem:[%s308_s3 + $0x28] sm:$0xff] %v113_v46  ;;  %v99_v48 = vmul.f32 0.2, %v67_v38  ;;  %v68_v49 = vadd.f32 %v177_v2, %v45_v40  ;;  %v48_v53 = vmul.f32 %v172_v1, %v25_v43 }
   0xe   :  { %v69_v50 = vadd.f32 %v177_v2, %v46_v41  ;;  %v70_v51 = vadd.f32 %v177_v2, %v47_v42  ;;  %v114_v52 = vsel %vm82_vm6, %v66_v37, %v98_v47  ;;  %v49_v54 = vmul.f32 %v172_v1, %v26_v44 }
   0xf   :  { %v50_v55 = vmul.f32 %v172_v1, %v27_v45  ;;  %130 = vst [vmem:[%s308_s3 + $0x30] sm:$0xff] %v114_v52  ;;  %v115_v57 = vsel %vm83_vm7, %v67_v38, %v99_v48  ;;  %vm84_vm8 = vcmp.ge.f32.partialorder %v68_v49, 0.0  ;;  %v100_v58 = vmul.f32 0.2, %v68_v49 }
  0x10   :  { %vm85_vm9 = vcmp.ge.f32.partialorder %v69_v50, 0.0  ;;  %131 = vst [vmem:[%s308_s3 + $0x38] sm:$0xff] %v115_v57  ;;  %v101_v59 = vmul.f32 0.2, %v69_v50  ;;  %vm86_vm10 = vcmp.ge.f32.partialorder %v70_v51, 0.0  ;;  %v71_v61 = vadd.f32 %v177_v2, %v48_v53 }
  0x11   :  { %v102_v60 = vmul.f32 0.2, %v70_v51  ;;  %v116_v62 = vsel %vm84_vm8, %v68_v49, %v100_v58  ;;  %v72_v63 = vadd.f32 %v177_v2, %v49_v54  ;;  %v73_v0 = vadd.f32 %v177_v2, %v50_v55 }
  0x12   :  { %v51_v3 = vmul.f32 %v172_v1, %v28_v56  ;;  %132 = vst [vmem:[%s308_s3 + $0x40] sm:$0xff] %v116_v62  ;;  %v117_v5 = vsel %vm85_vm9, %v69_v50, %v101_v59  ;;  %vm87_vm11 = vcmp.ge.f32.partialorder %v71_v61, 0.0  ;;  %v103_v7 = vmul.f32 0.2, %v71_v61 }
  0x13   :  { %v118_v6 = vsel %vm86_vm10, %v70_v51, %v102_v60  ;;  %133 = vst [vmem:[%s308_s3 + $0x48] sm:$0xff] %v117_v5  ;;  %vm88_vm12 = vcmp.ge.f32.partialorder %v72_v63, 0.0  ;;  %v104_v8 = vmul.f32 0.2, %v72_v63  ;;  %vm89_vm13 = vcmp.ge.f32.partialorder %v73_v0, 0.0 }
  0x14   :  { %134 = vst [vmem:[%s308_s3 + $0x50] sm:$0xff] %v118_v6  ;;  %v105_v9 = vmul.f32 0.2, %v73_v0  ;;  %v119_v10 = vsel %vm87_vm11, %v71_v61, %v103_v7  ;;  %v74_v11 = vadd.f32 %v177_v2, %v51_v3  ;;  %v52_v12 = vmul.f32 %v172_v1, %v29_v4 }
  0x15   :  { %135 = vst [vmem:[%s308_s3 + $0x58] sm:$0xff] %v119_v10  ;;  %v120_v13 = vsel %vm88_vm12, %v72_v63, %v104_v8 }
  0x16   :  { %v121_v14 = vsel %vm89_vm13, %v73_v0, %v105_v9  ;;  %136 = vst [vmem:[%s308_s3 + $0x60] sm:$0xff] %v120_v13  ;;  %vm90_vm14 = vcmp.ge.f32.partialorder %v74_v11, 0.0  ;;  %v106_v15 = vmul.f32 0.2, %v74_v11  ;;  %v75_v16 = vadd.f32 %v177_v2, %v52_v12 }
  0x17   :  { %137 = vst [vmem:[%s308_s3 + $0x68] sm:$0xff] %v121_v14 }
  0x18   :  { %v122_v17 = vsel %vm90_vm14, %v74_v11, %v106_v15  ;;  %vm91_vm15 = vcmp.ge.f32.partialorder %v75_v16, 0.0  ;;  %v107_v1 = vmul.f32 0.2, %v75_v16 }
  0x19   :  { %138 = vst [vmem:[%s308_s3 + $0x70] sm:$0xff] %v122_v17 }
  0x1a   :  { %v123_v18 = vsel %vm91_vm15, %v75_v16, %v107_v1 }
  0x1b   :  { %139 = vst [vmem:[%s308_s3 + $0x78] sm:$0xff] %v123_v18 }

// kernel: _lambda_.9
= control target key start
LH: loop header
LB: loop body
LE: loop exit
PB: predicated region body
PF: predicated region fallthrough
CT: control target
= control target key end

     0   :  { %s445_s1 = inlined_call_operand.vmem [shape: bf16[256,128], index: 1, kind: input, shape index: {}]   ;;  %s446_s0 = inlined_call_operand.vmem [shape: bf16[32,256], index: 0, kind: input, shape index: {}]   ;;  %s447_s2 = inlined_call_operand.vmem [shape: f32[32,128], index: 2, kind: output, shape index: {0}]   ;;  %s448_s3 = inlined_call_operand.vmem [shape: f32[1,8,128], index: 3, kind: output, shape index: {1}]   ;;  %s449_s4 = inlined_call_operand.vmem [shape: f32[1,8,128], index: 4, kind: output, shape index: {2}]  }
   0x1   :  { %v320_v0 = vld [vmem:[%s445_s1 + $0x78] sm:$0xff]   ;;  %v322_v2 = vld [vmem:[%s445_s1 + $0x70] sm:$0xff]   ;;  %v324_v4 = vld [vmem:[%s445_s1 + $0x68] sm:$0xff]  }
   0x2   :  { %v321_v1 = vld [vmem:[%s445_s1 + $0x38] sm:$0xff]   ;;  %276 = vmatprep.subr.bf16.mxu0 %v320_v0  ;;  %304 = vmatprep.subr.bf16.mxu1 %v320_v0  ;;  %v323_v3 = vld [vmem:[%s445_s1 + $0x30] sm:$0xff]   ;;  %v325_v5 = vld [vmem:[%s445_s1 + $0x28] sm:$0xff]  }
   0x3   :  { %277 = vmatpush3.bf16.msra.mxu0 %v321_v1  ;;  %312 = vmatpush3.bf16.msra.mxu1 %v321_v1  ;;  %v326_v6 = vld [vmem:[%s445_s1 + $0x60] sm:$0xff]   ;;  %v328_v8 = vld [vmem:[%s445_s1 + $0x58] sm:$0xff]   ;;  %v330_v10 = vld [vmem:[%s445_s1 + $0x50] sm:$0xff]  }
   0x4   :  { %278 = vmatprep.subr.bf16.mxu0 %v322_v2  ;;  %305 = vmatprep.subr.bf16.mxu1 %v322_v2  ;;  %v327_v7 = vld [vmem:[%s445_s1 + $0x20] sm:$0xff]   ;;  %v329_v9 = vld [vmem:[%s445_s1 + $0x18] sm:$0xff]   ;;  %v331_v13 = vld [vmem:[%s445_s1 + $0x10] sm:$0xff]  }
   0x5   :  { %v338_v11 = vld [vmem:[%s446_s0 + $0x4] ss:$8 sps:$4 sm:$0xff]   ;;  %v341_v12 = vld [vmem:[%s446_s0 + $0x14] ss:$8 sps:$4 sm:$0xff]   ;;  %v336_v18 = vld [vmem:[%s446_s0] ss:$8 sps:$4 sm:$0xff]  }
   0x6   :  { %v332_v14 = vld [vmem:[%s445_s1 + $0x48] sm:$0xff]   ;;  %199 = vmatprep.mubr.bf16.mxu0 %v338_v11  ;;  %207 = vmatprep.mubr.bf16.mxu1 %v341_v12  ;;  %v334_v16 = vld [vmem:[%s445_s1 + $0x40] sm:$0xff]   ;;  %v339_v19 = vld [vmem:[%s446_s0 + $0x10] ss:$8 sps:$4 sm:$0xff]  }
   0x7   :  { %279 = vmatpush3.bf16.msra.mxu0 %v323_v3  ;;  %313 = vmatpush3.bf16.msra.mxu1 %v323_v3  ;;  %v333_v15 = vld [vmem:[%s445_s1 + $0x8] sm:$0xff]   ;;  %v335_v17 = vld [vmem:[%s445_s1] sm:$0xff]  }
   0x8   :  { %280 = vmatprep.subr.bf16.mxu0 %v324_v4  ;;  %306 = vmatprep.subr.bf16.mxu1 %v324_v4 }
   0xb   :  { %281 = vmatpush3.bf16.msra.mxu0 %v325_v5  ;;  %314 = vmatpush3.bf16.msra.mxu1 %v325_v5 }
   0xc   :  { %282 = vmatprep.subr.bf16.mxu0 %v326_v6  ;;  %307 = vmatprep.subr.bf16.mxu1 %v326_v6 }
   0xf   :  { %283 = vmatpush3.bf16.msra.mxu0 %v327_v7  ;;  %315 = vmatpush3.bf16.msra.mxu1 %v327_v7 }
  0x10   :  { %284 = vmatprep.subr.bf16.mxu0 %v328_v8  ;;  %308 = vmatprep.subr.bf16.mxu1 %v328_v8 }
  0x13   :  { %285 = vmatpush3.bf16.msra.mxu0 %v329_v9  ;;  %316 = vmatpush3.bf16.msra.mxu1 %v329_v9 }
  0x14   :  { %286 = vmatprep.subr.bf16.mxu0 %v330_v10  ;;  %309 = vmatprep.subr.bf16.mxu1 %v330_v10 }
  0x17   :  { %287 = vmatpush3.bf16.msra.mxu0 %v331_v13  ;;  %317 = vmatpush3.bf16.msra.mxu1 %v331_v13 }
  0x18   :  { %288 = vmatprep.subr.bf16.mxu0 %v332_v14  ;;  %310 = vmatprep.subr.bf16.mxu1 %v332_v14 }
  0x1b   :  { %289 = vmatpush3.bf16.msra.mxu0 %v333_v15  ;;  %318 = vmatpush3.bf16.msra.mxu1 %v333_v15 }
  0x1c   :  { %290 = vmatprep.subr.bf16.mxu0 %v334_v16  ;;  %311 = vmatprep.subr.bf16.mxu1 %v334_v16 }
  0x1f   :  { %291 = vmatpush3.bf16.msra.mxu0 %v335_v17  ;;  %319 = vmatpush3.bf16.msra.mxu1 %v335_v17 }
  0x22   :  { %200 = vmatmul.mubr.bf16.vlgmr.msra.gmra.mxu0 %v336_v18  ;;  %208 = vmatmul.mubr.bf16.vlgmr.msra.gmra.mxu1 %v339_v19 }
  0xe2   :  { %v292_v20 = vpop.f32.mrf.mxu0  ;;  %v298_v21 = vpop.f32.mrf.mxu1 }
  0xe4   :  { %v293_v22 = vpop.f32.mrf.mxu0  ;;  %v299_v23 = vpop.f32.mrf.mxu1 }
  0xe5   :  { %v294_v24 = vadd.f32 %v293_v22, %v292_v20  ;;  %v300_v25 = vadd.f32 %v299_v23, %v298_v21 }
  0xe6   :  { %v295_v26 = vpop.f32.mrf.mxu0  ;;  %v301_v27 = vpop.f32.mrf.mxu1 }
  0xe7   :  { %216 = vst [vmem:[%s447_s2] sm:$0xff] %v294_v24  ;;  %218 = vst [vmem:[%s447_s2 + $0x10] sm:$0xff] %v300_v25  ;;  %v230_v32 = vmul.f32 %v294_v24, %v294_v24  ;;  %v232_v35 = vmul.f32 %v300_v25, %v300_v25 }
  0xe8   :  { %v296_v28 = vpop.f32.mrf.mxu0  ;;  %v302_v29 = vpop.f32.mrf.mxu1 }
  0xe9   :  { %v297_v30 = vadd.f32 %v296_v28, %v295_v26  ;;  %v303_v31 = vadd.f32 %v302_v29, %v301_v27 }
  0xeb   :  { %217 = vst [vmem:[%s447_s2 + $0x8] sm:$0xff] %v297_v30  ;;  %v220_v33 = vadd.f32 %v297_v30, %v294_v24  ;;  %v231_v34 = vmul.f32 %v297_v30, %v297_v30  ;;  %219 = vst [vmem:[%s447_s2 + $0x18] sm:$0xff] %v303_v31  ;;  %v233_v39 = vmul.f32 %v303_v31, %v303_v31 }
  0xed   :  { %v234_v36 = vadd.f32 %v231_v34, %v230_v32  ;;  %v221_v37 = vadd.f32 %v300_v25, %v220_v33 }
  0xef   :  { %v222_v38 = vadd.f32 %v303_v31, %v221_v37  ;;  %v235_v40 = vadd.f32 %v234_v36, %v232_v35 }
  0xf1   :  { %v223_v41 = vrot.slane %v222_v38, 4  ;;  %v236_v42 = vadd.f32 %v235_v40, %v233_v39 }
  0xf3   :  { %v224_v43 = vadd.f32 %v223_v41, %v222_v38  ;;  %v237_v44 = vrot.slane %v236_v42, 4 }
  0xf5   :  { %v225_v45 = vrot.slane %v224_v43, 2  ;;  %v238_v46 = vadd.f32 %v237_v44, %v236_v42 }
  0xf7   :  { %v226_v47 = vadd.f32 %v225_v45, %v224_v43  ;;  %v239_v48 = vrot.slane %v238_v46, 2 }
  0xf9   :  { %v227_v49 = vrot.slane %v226_v47, 1  ;;  %v240_v50 = vadd.f32 %v239_v48, %v238_v46 }
  0xfb   :  { %v228_v51 = vadd.f32 %v227_v49, %v226_v47  ;;  %v241_v52 = vrot.slane %v240_v50, 1 }
  0xfd   :  { %229 = vst [vmem:[%s448_s3] sm:$0xff] %v228_v51  ;;  %v242_v53 = vadd.f32 %v241_v52, %v240_v50 }
  0xff   :  { %243 = vst [vmem:[%s449_s4] sm:$0xff] %v242_v53 }

// kernel: _lambda_.10
= control target key start
LH: loop header
LB: loop body
LE: loop exit
PB: predicated region body
PF: predicated region fallthrough
CT: control target
= control target key end

     0   :  { %s112_s0 = inlined_call_operand.vmem [shape: f32[32,128], index: 0, kind: input, shape index: {}]   ;;  %s113_s1 = inlined_call_operand.vmem [shape: f32[1,128], index: 1, kind: input, shape index: {}]   ;;  %s114_s2 = inlined_call_operand.vmem [shape: f32[1,128], index: 2, kind: input, shape index: {}]   ;;  %s115_s3 = inlined_call_operand.vmem [shape: f32[32,128], index: 3, kind: output, shape index: {}]  }
   0x1   :  { %v14_v0 = vld [vmem:[%s112_s0] sm:$0xff]  ;;  %v15_v4 = vld [vmem:[%s112_s0 + $0x8] sm:$0xff]  ;;  %v16_v5 = vld [vmem:[%s112_s0 + $0x10] sm:$0xff] }
   0x2   :  { %v60_v1 = vld [vmem:[%s113_s1] ss:$0 sm:$0xff]  ;;  %v17_v6 = vld [vmem:[%s112_s0 + $0x18] sm:$0xff] }
   0x3   :  { %v61_v2 = vld [vmem:[%s114_s2] ss:$0 sm:$0xff]  ;;  %v25_v3 = vmul.f32 %v60_v1, %v14_v0  ;;  %v26_v7 = vmul.f32 %v60_v1, %v15_v4  ;;  %v27_v8 = vmul.f32 %v60_v1, %v16_v5  ;;  %v28_v9 = vmul.f32 %v60_v1, %v17_v6 }
   0x5   :  { %v36_v10 = vadd.f32 %v61_v2, %v25_v3  ;;  %v37_v11 = vadd.f32 %v61_v2, %v26_v7  ;;  %v38_v12 = vadd.f32 %v61_v2, %v27_v8  ;;  %v39_v13 = vadd.f32 %v61_v2, %v28_v9 }
   0x7   :  { %vm40_vm0 = vcmp.ge.f32.partialorder %v36_v10, 0.0  ;;  %v44_v14 = vmul.f32 0.2, %v36_v10  ;;  %vm41_vm1 = vcmp.ge.f32.partialorder %v37_v11, 0.0  ;;  %v45_v15 = vmul.f32 0.2, %v37_v11 }
   0x8   :  { %vm42_vm2 = vcmp.ge.f32.partialorder %v38_v12, 0.0  ;;  %v46_v16 = vmul.f32 0.2, %v38_v12  ;;  %vm43_vm3 = vcmp.ge.f32.partialorder %v39_v13, 0.0  ;;  %v47_v18 = vmul.f32 0.2, %v39_v13 }
   0x9   :  { %v48_v17 = vsel %vm40_vm0, %v36_v10, %v44_v14  ;;  %v49_v19 = vsel %vm41_vm1, %v37_v11, %v45_v15 }
   0xa   :  { %52 = vst [vmem:[%s115_s3] sm:$0xff] %v48_v17  ;;  %v50_v20 = vsel %vm42_vm2, %v38_v12, %v46_v16  ;;  %53 = vst [vmem:[%s115_s3 + $0x8] sm:$0xff] %v49_v19  ;;  %v51_v21 = vsel %vm43_vm3, %v39_v13, %v47_v18 }
   0xb   :  { %54 = vst [vmem:[%s115_s3 + $0x10] sm:$0xff] %v50_v20  ;;  %55 = vst [vmem:[%s115_s3 + $0x18] sm:$0xff] %v51_v21 }

// kernel: _lambda_.11
= control target key start
LH: loop header
LB: loop body
LE: loop exit
PB: predicated region body
PF: predicated region fallthrough
CT: control target
= control target key end

     0   :  { %s616_s1 = inlined_call_operand.vmem [shape: bf16[512,128], index: 1, kind: input, shape index: {}]   ;;  %s617_s0 = inlined_call_operand.vmem [shape: bf16[8,512], index: 0, kind: input, shape index: {}]   ;;  %s618_s2 = inlined_call_operand.vmem [shape: f32[8,128], index: 2, kind: output, shape index: {}]  }
   0x1   :  { %v456_v0 = vld [vmem:[%s616_s1 + $0x78] sm:$0xff]   ;;  %v460_v4 = vld [vmem:[%s616_s1 + $0x70] sm:$0xff]   ;;  %v464_v8 = vld [vmem:[%s616_s1 + $0x68] sm:$0xff]  }
   0x2   :  { %v457_v1 = vld [vmem:[%s616_s1 + $0xf8] sm:$0xff]   ;;  %412 = vmatprep.subr.bf16.mxu0 %v456_v0  ;;  %v461_v5 = vld [vmem:[%s616_s1 + $0xf0] sm:$0xff]   ;;  %v465_v9 = vld [vmem:[%s616_s1 + $0xe8] sm:$0xff]  }
   0x3   :  { %v458_v2 = vld [vmem:[%s616_s1 + $0x38] sm:$0xff]   ;;  %434 = vmatprep.subr.bf16.mxu1 %v457_v1  ;;  %v462_v6 = vld [vmem:[%s616_s1 + $0x30] sm:$0xff]   ;;  %v466_v10 = vld [vmem:[%s616_s1 + $0x28] sm:$0xff]  }
   0x4   :  { %v459_v3 = vld [vmem:[%s616_s1 + $0xb8] sm:$0xff]   ;;  %413 = vmatpush3.bf16.msra.mxu0 %v458_v2  ;;  %v463_v7 = vld [vmem:[%s616_s1 + $0xb0] sm:$0xff]   ;;  %v467_v11 = vld [vmem:[%s616_s1 + $0xa8] sm:$0xff]  }
   0x5   :  { %435 = vmatpush3.bf16.msra.mxu1 %v459_v3  ;;  %414 = vmatprep.subr.bf16.mxu0 %v460_v4  ;;  %v468_v12 = vld [vmem:[%s616_s1 + $0x60] sm:$0xff]   ;;  %v472_v16 = vld [vmem:[%s616_s1 + $0x58] sm:$0xff]   ;;  %v476_v20 = vld [vmem:[%s616_s1 + $0x50] sm:$0xff]  }
   0x6   :  { %436 = vmatprep.subr.bf16.mxu1 %v461_v5  ;;  %v469_v13 = vld [vmem:[%s616_s1 + $0xe0] sm:$0xff]   ;;  %v473_v17 = vld [vmem:[%s616_s1 + $0xd8] sm:$0xff]   ;;  %v477_v21 = vld [vmem:[%s616_s1 + $0xd0] sm:$0xff]  }
   0x7   :  { %v470_v14 = vld [vmem:[%s616_s1 + $0x20] sm:$0xff]   ;;  %v474_v18 = vld [vmem:[%s616_s1 + $0x18] sm:$0xff]   ;;  %v478_v22 = vld [vmem:[%s616_s1 + $0x10] sm:$0xff]  }
   0x8   :  { %415 = vmatpush3.bf16.msra.mxu0 %v462_v6  ;;  %v471_v15 = vld [vmem:[%s616_s1 + $0xa0] sm:$0xff]   ;;  %v475_v19 = vld [vmem:[%s616_s1 + $0x98] sm:$0xff]   ;;  %v479_v23 = vld [vmem:[%s616_s1 + $0x90] sm:$0xff]  }
   0x9   :  { %437 = vmatpush3.bf16.msra.mxu1 %v463_v7  ;;  %416 = vmatprep.subr.bf16.mxu0 %v464_v8  ;;  %v480_v24 = vld [vmem:[%s616_s1 + $0x48] sm:$0xff]   ;;  %v484_v28 = vld [vmem:[%s616_s1 + $0x40] sm:$0xff]  }
   0xa   :  { %438 = vmatprep.subr.bf16.mxu1 %v465_v9  ;;  %v481_v25 = vld [vmem:[%s616_s1 + $0xc8] sm:$0xff]   ;;  %v485_v29 = vld [vmem:[%s616_s1 + $0xc0] sm:$0xff]  }
   0xb   :  { %v482_v26 = vld [vmem:[%s616_s1 + $0x8] sm:$0xff]   ;;  %v486_v30 = vld [vmem:[%s616_s1] sm:$0xff]  }
   0xc   :  { %417 = vmatpush3.bf16.msra.mxu0 %v466_v10  ;;  %v483_v27 = vld [vmem:[%s616_s1 + $0x88] sm:$0xff]   ;;  %v487_v31 = vld [vmem:[%s616_s1 + $0x80] sm:$0xff]  }
   0xd   :  { %439 = vmatpush3.bf16.msra.mxu1 %v467_v11  ;;  %418 = vmatprep.subr.bf16.mxu0 %v468_v12  ;;  %v12_v32 = vld [vmem:[%s617_s0] sm:$0xff]  ;;  %v13_v33 = vld [vmem:[%s617_s0 + $0x8] sm:$0xff] }
   0xe   :  { %440 = vmatprep.subr.bf16.mxu1 %v469_v13  ;;  %v375_v34 = vcombine.low %v12_v32, %v12_v32  ;;  %v376_v35 = vcombine.high %v12_v32, %v12_v32  ;;  %v377_v36 = vcombine.low %v13_v33, %v13_v33  ;;  %v378_v37 = vcombine.high %v13_v33, %v13_v33 }
  0x10   :  { %419 = vmatpush3.bf16.msra.mxu0 %v470_v14  ;;  %316 = vmatprep.mubr.bf16.mxu0 %v376_v35 }
  0x11   :  { %441 = vmatpush3.bf16.msra.mxu1 %v471_v15  ;;  %420 = vmatprep.subr.bf16.mxu0 %v472_v16 }
  0x12   :  { %442 = vmatprep.subr.bf16.mxu1 %v473_v17  ;;  %356 = vmatprep.mubr.bf16.mxu1 %v378_v37 }
  0x14   :  { %421 = vmatpush3.bf16.msra.mxu0 %v474_v18 }
  0x15   :  { %443 = vmatpush3.bf16.msra.mxu1 %v475_v19  ;;  %422 = vmatprep.subr.bf16.mxu0 %v476_v20 }
  0x16   :  { %444 = vmatprep.subr.bf16.mxu1 %v477_v21 }
  0x18   :  { %423 = vmatpush3.bf16.msra.mxu0 %v478_v22 }
  0x19   :  { %445 = vmatpush3.bf16.msra.mxu1 %v479_v23  ;;  %424 = vmatprep.subr.bf16.mxu0 %v480_v24 }
  0x1a   :  { %446 = vmatprep.subr.bf16.mxu1 %v481_v25 }
  0x1c   :  { %425 = vmatpush3.bf16.msra.mxu0 %v482_v26 }
  0x1d   :  { %447 = vmatpush3.bf16.msra.mxu1 %v483_v27  ;;  %426 = vmatprep.subr.bf16.mxu0 %v484_v28 }
  0x1e   :  { %448 = vmatprep.subr.bf16.mxu1 %v485_v29 }
  0x20   :  { %427 = vmatpush3.bf16.msra.mxu0 %v486_v30 }
  0x21   :  { %449 = vmatpush3.bf16.msra.mxu1 %v487_v31 }
  0x23   :  { %317 = vmatmul.mubr.bf16.vlgmr.msra.gmra.mxu0 %v375_v34 }
  0x24   :  { %357 = vmatmul.mubr.bf16.vlgmr.msra.gmra.mxu1 %v377_v36 }
  0xe3   :  { %v428_v38 = vpop.f32.mrf.mxu0 }
  0xe4   :  { %v450_v39 = vpop.f32.mrf.mxu1 }
  0xe5   :  { %v429_v40 = vpop.f32.mrf.mxu0 }
  0xe6   :  { %v451_v41 = vpop.f32.mrf.mxu1  ;;  %v430_v42 = vadd.f32 %v429_v40, %v428_v38 }
  0xe7   :  { %v452_v43 = vadd.f32 %v451_v41, %v450_v39  ;;  %v431_v44 = vpop.f32.mrf.mxu0 }
  0xe8   :  { %v453_v45 = vpop.f32.mrf.mxu1 }
  0xe9   :  { %v359_v46 = vadd.f32 %v452_v43, %v430_v42  ;;  %v432_v47 = vpop.f32.mrf.mxu0 }
  0xea   :  { %v454_v48 = vpop.f32.mrf.mxu1 }
  0xeb   :  { %v411_v49 = vmul.f32 -1.442695, %v359_v46 }
  0xed   :  { %492 = vpow2.f32 %v411_v49 }
  0xfa   :  { %v493_v50 = vpop.eup %492 }
  0xfb   :  { %v367_v51 = vadd.f32 1.0, %v493_v50 }
  0xfd   :  { %494 = vrcp.f32 %v367_v51 }
 0x10a   :  { %v495_v52 = vpop.eup %494 }
 0x10b   :  { %370 = vst [vmem:[%s618_s2] sm:$0xff] %v495_v52 }

</bundles_post_ra>
